<compile_context>
chip_gen: v6e
topology: v6e:2x2x1
jax: 0.10.0
libtpu: 0.0.40
codegen_flags: <defaults>
</compile_context>

<pallas_src>
import functools

import jax
import jax.numpy as jnp
from jax.experimental import pallas as pl
from jax.experimental.pallas import tpu as pltpu


# ---------------------------------------------------------------------------
# Fused per-block kernel: grid = (batch_tiles, depth)
# ---------------------------------------------------------------------------

def _vit_block_kernel(patches_ref, patch_w_ref, addmat_ref, normg_ref, normb_ref,
                      ln1g_ref, ln1b_ref, qkvw_ref, qkvb_ref,
                      projw_ref, projb_ref, ln2g_ref, ln2b_ref,
                      fc1w_ref, fc1b_ref, fc2w_ref, fc2b_ref,
                      out_ref, tok_ref, *,
                      batch_tile, seq, num_heads, head_dim, layer_indices, eps):
    layer = pl.program_id(1)
    D = num_heads * head_dim
    scale = head_dim ** -0.5

    def mm(a, b):
        # MXU matmul: bf16 operands, f32 accumulation.
        return jax.lax.dot_general(
            a.astype(jnp.bfloat16), b.astype(jnp.bfloat16),
            dimension_numbers=(((1,), (0,)), ((), ())),
            preferred_element_type=jnp.float32)

    def mm_t(a, b):
        # (M, K) x (N, K) -> (M, N): contract last dims, no explicit transpose.
        return jax.lax.dot_general(
            a.astype(jnp.bfloat16), b.astype(jnp.bfloat16),
            dimension_numbers=(((1,), (1,)), ((), ())),
            preferred_element_type=jnp.float32)

    def layer_norm(x, g, b):
        m = jnp.mean(x, axis=-1, keepdims=True)
        v = jnp.mean(jnp.square(x - m), axis=-1, keepdims=True)
        return (x - m) * jax.lax.rsqrt(v + eps) * g + b

    # patch_embed (conv PxP stride P == unfold + matmul) with cls token,
    # position embedding and patch bias folded into the matmul epilogue.
    @pl.when(layer == 0)
    def _():
        tok_ref[...] = mm(patches_ref[0], patch_w_ref[...]) + addmat_ref[...]

    tok = tok_ref[...]                                            # (T, D) f32

    # ---- attention branch (pre-LN): one fused (T,D)x(D,3D) qkv matmul ----
    xn = layer_norm(tok, ln1g_ref[0], ln1b_ref[0])
    qkv = mm(xn, qkvw_ref[0]) + qkvb_ref[0]                       # (T, 3D) f32

    batch_rows = []
    for b in range(batch_tile):
        r0 = b * seq
        head_cols = []
        for h in range(num_heads):
            c0 = h * head_dim
            q = qkv[r0:r0 + seq, c0:c0 + head_dim]
            k = qkv[r0:r0 + seq, D + c0:D + c0 + head_dim]
            v = qkv[r0:r0 + seq, 2 * D + c0:2 * D + c0 + head_dim]
            s = mm_t(q, k) * scale                                # (seq, seq)
            s = s - jnp.max(s, axis=-1, keepdims=True)
            p = jnp.exp(s)
            p = p * pl.reciprocal(jnp.sum(p, axis=-1, keepdims=True), approx=True)
            head_cols.append(mm(p, v))                            # (seq, Dh)
        batch_rows.append(jnp.concatenate(head_cols, axis=-1))    # (seq, D)
    o = jnp.concatenate(batch_rows, axis=0)                       # (T, D)

    # single fused (T,D)x(D,D) output projection per layer
    tok = tok + mm(o, projw_ref[0]) + projb_ref[0]

    # ---- MLP branch (pre-LN) ----
    xn = layer_norm(tok, ln2g_ref[0], ln2b_ref[0])
    h1 = jax.nn.gelu(mm(xn, fc1w_ref[0]) + fc1b_ref[0], approximate=True)
    tok = tok + mm(h1, fc2w_ref[0]) + fc2b_ref[0]
    tok_ref[...] = tok

    # ---- feature extraction: final LayerNorm into the lane-dense output ----
    for oi, li in enumerate(layer_indices):
        @pl.when(layer == li - 1)
        def _(oi=oi):
            feats = layer_norm(tok, normg_ref[...], normb_ref[...])
            out_ref[0, :, oi * D:(oi + 1) * D] = feats.astype(out_ref.dtype)


# ---------------------------------------------------------------------------
# Host-side packing + wrapper
# ---------------------------------------------------------------------------

def pack_params(params, *, run_depth):
    """Repack torch-layout params into per-layer stacked arrays (matmul weights
    in bf16; biases / LayerNorm params kept f32)."""
    bf16 = jnp.bfloat16
    blocks = params["blocks"][:run_depth]

    def stack(key):
        return jnp.stack([bp[key] for bp in blocks], axis=0)

    return dict(
        patch_w=params["patch_w"].astype(bf16),                   # (CPP, D)
        ln1_g=stack("ln1_g")[:, None, :], ln1_b=stack("ln1_b")[:, None, :],
        qkv_w=stack("qkv_w").astype(bf16),                        # (L, D, 3D)
        qkv_b=stack("qkv_b")[:, None, :],                         # (L, 1, 3D)
        proj_w=stack("proj_w").astype(bf16),                      # (L, D, D)
        proj_b=stack("proj_b")[:, None, :],
        ln2_g=stack("ln2_g")[:, None, :], ln2_b=stack("ln2_b")[:, None, :],
        fc1_w=stack("fc1_w").astype(bf16), fc1_b=stack("fc1_b")[:, None, :],
        fc2_w=stack("fc2_w").astype(bf16), fc2_b=stack("fc2_b")[:, None, :],
        norm_g=params["norm_g"][None, :], norm_b=params["norm_b"][None, :],
    )


def _pick_batch_tile(B, cap=8):
    bt = 1
    for c in range(2, min(B, cap) + 1):
        if B % c == 0:
            bt = c
    return bt


def _vmem_limit_bytes():
    # Size the scoped-VMEM budget per TPU generation: leave headroom on v7x's
    # 64 MiB per-TC VMEM, allow larger tiles on the 128 MiB v5e/v6e parts.
    try:
        cap = pltpu.get_tpu_info().vmem_capacity_bytes
    except Exception:
        return 32 * 1024 * 1024
    return min((int(cap) * 3) // 4, 100 * 1024 * 1024)


def feature_extractor_vit_forward(x, params, *, layer_indices, patch_size, num_heads,
                                  batch_tile=None):
    """Pallas-backed FeatureExtractor_ViT.forward (output_attn=False)."""
    B, C, Himg, Wimg = x.shape
    P = patch_size
    Hp, Wp = Himg // P, Wimg // P
    Np = Hp * Wp
    CPP = C * P * P
    D = params["patch_w"].shape[1]
    N = Np + 1                      # cls + patches
    start_index = 1                 # no "regN" register tokens in this config
    layer_indices = tuple(sorted(layer_indices))
    run_depth = max(layer_indices)  # PyTorch loop breaks after this block
    n_sel = len(layer_indices)

    if batch_tile is None:
        batch_tile = _pick_batch_tile(B)
    assert B % batch_tile == 0
    nbt = B // batch_tile
    T = batch_tile * N              # token rows per grid step

    # Patch unfold (layout glue on the tiny input) plus one zero "cls row" per
    # image; pre-cast to bf16 (matmul operand dtype) and flatten batch tiles.
    patches = (x.reshape(B, C, Hp, P, Wp, P)
                .transpose(0, 2, 4, 1, 3, 5)
                .reshape(B, Np, CPP))
    patches = jnp.concatenate([jnp.zeros((B, 1, CPP), x.dtype), patches], axis=1)
    patches = patches.reshape(nbt, T, CPP).astype(jnp.bfloat16)

    # cls + pos + patch bias folded into one additive matrix: row 0 per image is
    # cls_token + pos[0]; rows 1.. are patch_bias + pos[1:]; tiled over the tile.
    addmat = jnp.concatenate(
        [params["cls_token"][0] + params["pos_embed"][0, :1],
         params["patch_b"][None, :] + params["pos_embed"][0, 1:]], axis=0)
    addmat = jnp.tile(addmat, (batch_tile, 1))                     # (T, D) f32

    packed = pack_params(params, run_depth=run_depth)
    const_inputs = [packed["patch_w"], addmat, packed["norm_g"], packed["norm_b"]]
    layer_inputs = [packed[k] for k in (
        "ln1_g", "ln1_b", "qkv_w", "qkv_b", "proj_w", "proj_b",
        "ln2_g", "ln2_b", "fc1_w", "fc1_b", "fc2_w", "fc2_b")]

    def _const_spec(a):
        zeros = (0,) * a.ndim
        return pl.BlockSpec(a.shape, lambda bt, l, _z=zeros: _z)

    def _layer_spec(a):
        # Stream one layer's weights per depth grid step.
        return pl.BlockSpec((1,) + a.shape[1:], lambda bt, l: (l, 0, 0))

    kernel = functools.partial(
        _vit_block_kernel, batch_tile=batch_tile, seq=N, num_heads=num_heads,
        head_dim=D // num_heads, layer_indices=layer_indices, eps=1e-6)

    out = pl.pallas_call(
        kernel,
        grid=(nbt, run_depth),
        in_specs=[pl.BlockSpec((1, T, CPP), lambda bt, l: (bt, 0, 0))]
                 + [_const_spec(a) for a in const_inputs]
                 + [_layer_spec(a) for a in layer_inputs],
        out_specs=pl.BlockSpec((1, T, n_sel * D), lambda bt, l: (bt, 0, 0)),
        out_shape=jax.ShapeDtypeStruct((nbt, T, n_sel * D), jnp.float32),
        scratch_shapes=[pltpu.VMEM((T, D), jnp.float32)],   # tok carried over depth
        compiler_params=pltpu.CompilerParams(
            dimension_semantics=("parallel", "arbitrary"),   # batch tiles parallel
            vmem_limit_bytes=_vmem_limit_bytes()),
    )(patches, *const_inputs, *layer_inputs)

    # Drop the cls row (start_index); the selected-layer channel concat was
    # already done lane-dense inside the kernel.
    feats = out.reshape(B, N, n_sel * D)
    return feats[:, start_index:, :]


# ---------------------------------------------------------------------------
# Pure-JAX reference (same math & same bf16-at-MXU convention, no Pallas)
# ---------------------------------------------------------------------------

def _ref_mm(a, b):
    return jnp.dot(a.astype(jnp.bfloat16), b.astype(jnp.bfloat16),
                   preferred_element_type=jnp.float32)


def _ref_ln(x, g, b, eps=1e-6):
    m = jnp.mean(x, axis=-1, keepdims=True)
    v = jnp.mean(jnp.square(x - m), axis=-1, keepdims=True)
    return (x - m) * jax.lax.rsqrt(v + eps) * g + b


def ref_forward(x, params, *, layer_indices, patch_size, num_heads):
    B, C, Himg, Wimg = x.shape
    P = patch_size
    Hp, Wp = Himg // P, Wimg // P
    bf16 = jnp.bfloat16
    patches = (x.reshape(B, C, Hp, P, Wp, P)
                .transpose(0, 2, 4, 1, 3, 5)
                .reshape(B * Hp * Wp, C * P * P))
    tok = _ref_mm(patches, params["patch_w"]) + params["patch_b"]
    D = tok.shape[-1]
    tok = tok.reshape(B, Hp * Wp, D)
    cls = jnp.broadcast_to(params["cls_token"], (B, 1, D))
    tok = jnp.concatenate([cls, tok], axis=1) + params["pos_embed"]
    N = tok.shape[1]
    Dh = D // num_heads
    out = []
    for idx, bp in enumerate(params["blocks"], start=1):
        h = _ref_ln(tok, bp["ln1_g"], bp["ln1_b"])
        qkv = _ref_mm(h.reshape(B * N, D), bp["qkv_w"]) + bp["qkv_b"]
        qkv = qkv.reshape(B, N, 3, num_heads, Dh).transpose(2, 0, 3, 1, 4)
        q, k, v = qkv[0], qkv[1], qkv[2]
        s = jnp.einsum("bhnd,bhmd->bhnm", q.astype(bf16), k.astype(bf16),
                       preferred_element_type=jnp.float32) * (Dh ** -0.5)
        p = jax.nn.softmax(s, axis=-1)
        o = jnp.einsum("bhnm,bhmd->bhnd", p.astype(bf16), v.astype(bf16),
                       preferred_element_type=jnp.float32)
        o = o.transpose(0, 2, 1, 3).reshape(B * N, D)
        tok = tok + (_ref_mm(o, bp["proj_w"]) + bp["proj_b"]).reshape(B, N, D)
        h = _ref_ln(tok, bp["ln2_g"], bp["ln2_b"])
        h1 = jax.nn.gelu(_ref_mm(h.reshape(B * N, D), bp["fc1_w"]) + bp["fc1_b"],
                         approximate=True)
        tok = tok + _ref_mm(h1, bp["fc2_w"]).reshape(B, N, D) + bp["fc2_b"]
        if idx in layer_indices:
            out.append(_ref_ln(tok[:, 1:, :], params["norm_g"], params["norm_b"]))
        if idx == max(layer_indices):
            break
    return jnp.concatenate(out, axis=-1)


# ---------------------------------------------------------------------------
# Deterministic parameter init (torch-like layout, f32)
# ---------------------------------------------------------------------------

def init_params(key, *, C, P, D, num_heads, depth, mlp_ratio, num_tokens):
    del num_heads
    mlp_hidden = mlp_ratio * D

    def nrm(k, shape):
        return (0.02 * jax.random.normal(k, shape)).astype(jnp.float32)

    keys = jax.random.split(key, 3 + depth)
    params = {
        "patch_w": nrm(keys[0], (C * P * P, D)),
        "patch_b": jnp.zeros((D,), jnp.float32),
        "cls_token": nrm(keys[1], (1, 1, D)),
        "pos_embed": nrm(keys[2], (1, num_tokens, D)),
        "norm_g": jnp.ones((D,), jnp.float32),
        "norm_b": jnp.zeros((D,), jnp.float32),
        "blocks": [],
    }
    for i in range(depth):
        bk = jax.random.split(keys[3 + i], 4)
        params["blocks"].append({
            "ln1_g": jnp.ones((D,), jnp.float32), "ln1_b": jnp.zeros((D,), jnp.float32),
            "qkv_w": nrm(bk[0], (D, 3 * D)), "qkv_b": jnp.zeros((3 * D,), jnp.float32),
            "proj_w": nrm(bk[1], (D, D)), "proj_b": jnp.zeros((D,), jnp.float32),
            "ln2_g": jnp.ones((D,), jnp.float32), "ln2_b": jnp.zeros((D,), jnp.float32),
            "fc1_w": nrm(bk[2], (D, mlp_hidden)), "fc1_b": jnp.zeros((mlp_hidden,), jnp.float32),
            "fc2_w": nrm(bk[3], (mlp_hidden, D)), "fc2_b": jnp.zeros((D,), jnp.float32),
        })
    return params


if __name__ == "__main__":
    # Small synthetic ViT config
    B, C, IMG = 2, 3, 16
    PATCH = 8
    D, HEADS, DEPTH, MLP_RATIO = 32, 4, 2, 4
    LAYER_INDICES = (1, 2)
    num_patches = (IMG // PATCH) ** 2          # 4
    num_tokens = num_patches + 1               # cls + patches

    key = jax.random.PRNGKey(0)
    kx, kp = jax.random.split(key)
    x = jax.random.normal(kx, (B, C, IMG, IMG), jnp.float32)   # NCHW, like PyTorch
    params = init_params(kp, C=C, P=PATCH, D=D, num_heads=HEADS, depth=DEPTH,
                         mlp_ratio=MLP_RATIO, num_tokens=num_tokens)

    fwd = jax.jit(functools.partial(
        feature_extractor_vit_forward,
        layer_indices=LAYER_INDICES, patch_size=PATCH, num_heads=HEADS))
    features = jax.block_until_ready(fwd(x, params))

    expected_shape = (B, num_patches, len(LAYER_INDICES) * D)
    assert features.shape == expected_shape, (features.shape, expected_shape)

    ref = ref_forward(x, params, layer_indices=LAYER_INDICES,
                      patch_size=PATCH, num_heads=HEADS)
    # Tolerance accounts for the approximate EUP reciprocal in the in-kernel
    # softmax and for accumulation-order differences of the bf16 MXU matmuls.
    max_err = float(jnp.max(jnp.abs(features - ref)))
    assert jnp.allclose(features, ref, rtol=1e-2, atol=1e-2), max_err

    print("KERNEL_OK")
</pallas_src>

<mosaic_0001>
module attributes {stable_mosaic.version = 11 : i64} {
  func.func @_vit_block_kernel(%arg0: i32, %arg1: i32, %arg2: memref<1x10x192xbf16, #tpu.memory_space<vmem>>, %arg3: memref<192x32xbf16, #tpu.memory_space<vmem>>, %arg4: memref<10x32xf32, #tpu.memory_space<vmem>>, %arg5: memref<1x32xf32, #tpu.memory_space<vmem>>, %arg6: memref<1x32xf32, #tpu.memory_space<vmem>>, %arg7: memref<1x1x32xf32, #tpu.memory_space<vmem>>, %arg8: memref<1x1x32xf32, #tpu.memory_space<vmem>>, %arg9: memref<1x32x96xbf16, #tpu.memory_space<vmem>>, %arg10: memref<1x1x96xf32, #tpu.memory_space<vmem>>, %arg11: memref<1x32x32xbf16, #tpu.memory_space<vmem>>, %arg12: memref<1x1x32xf32, #tpu.memory_space<vmem>>, %arg13: memref<1x1x32xf32, #tpu.memory_space<vmem>>, %arg14: memref<1x1x32xf32, #tpu.memory_space<vmem>>, %arg15: memref<1x32x128xbf16, #tpu.memory_space<vmem>>, %arg16: memref<1x1x128xf32, #tpu.memory_space<vmem>>, %arg17: memref<1x128x32xbf16, #tpu.memory_space<vmem>>, %arg18: memref<1x1x32xf32, #tpu.memory_space<vmem>>, %arg19: memref<1x10x64xf32, #tpu.memory_space<vmem>>, %arg20: memref<10x32xf32, #tpu.memory_space<vmem>>) attributes {dimension_semantics = [#tpu.dimension_semantics<parallel>, #tpu.dimension_semantics<arbitrary>], iteration_bounds = array<i64: 1, 2>, scalar_prefetch = 0 : i64, scratch_operands = 1 : i64, tpu.core_type = #tpu.core_type<tc>, window_params = [{transform_indices = @transform_0, window_bounds = array<i64: 1, 10, 192>}, {pipeline_mode = #tpu.pipeline_mode<synchronous>, transform_indices = @transform_1, window_bounds = array<i64: 192, 32>}, {pipeline_mode = #tpu.pipeline_mode<synchronous>, transform_indices = @transform_2, window_bounds = array<i64: 10, 32>}, {pipeline_mode = #tpu.pipeline_mode<synchronous>, transform_indices = @transform_3, window_bounds = array<i64: 1, 32>}, {pipeline_mode = #tpu.pipeline_mode<synchronous>, transform_indices = @transform_4, window_bounds = array<i64: 1, 32>}, {transform_indices = @transform_5, window_bounds = array<i64: 1, 1, 32>}, {transform_indices = @transform_6, window_bounds = array<i64: 1, 1, 32>}, {transform_indices = @transform_7, window_bounds = array<i64: 1, 32, 96>}, {transform_indices = @transform_8, window_bounds = array<i64: 1, 1, 96>}, {transform_indices = @transform_9, window_bounds = array<i64: 1, 32, 32>}, {transform_indices = @transform_10, window_bounds = array<i64: 1, 1, 32>}, {transform_indices = @transform_11, window_bounds = array<i64: 1, 1, 32>}, {transform_indices = @transform_12, window_bounds = array<i64: 1, 1, 32>}, {transform_indices = @transform_13, window_bounds = array<i64: 1, 32, 128>}, {transform_indices = @transform_14, window_bounds = array<i64: 1, 1, 128>}, {transform_indices = @transform_15, window_bounds = array<i64: 1, 128, 32>}, {transform_indices = @transform_16, window_bounds = array<i64: 1, 1, 32>}, {transform_indices = @transform_17, window_bounds = array<i64: 1, 10, 64>}]} {
    %c0_i32 = arith.constant 0 : i32
    %0 = arith.cmpi eq, %arg1, %c0_i32 : i32
    %1 = arith.extui %0 : i1 to i32
    %c0_i32_0 = arith.constant 0 : i32
    %2 = arith.cmpi ne, %1, %c0_i32_0 : i32
    scf.if %2 {
      %c0_100 = arith.constant 0 : index
      %c0_101 = arith.constant 0 : index
      %c0_102 = arith.constant 0 : index
      %281 = vector.load %arg2[%c0_100, %c0_101, %c0_102] : memref<1x10x192xbf16, #tpu.memory_space<vmem>>, vector<1x10x192xbf16>
      %282 = vector.shape_cast %281 : vector<1x10x192xbf16> to vector<10x192xbf16>
      %c0_103 = arith.constant 0 : index
      %c0_104 = arith.constant 0 : index
      %283 = vector.load %arg3[%c0_103, %c0_104] : memref<192x32xbf16, #tpu.memory_space<vmem>>, vector<192x32xbf16>
      %cst_105 = arith.constant dense<0.000000e+00> : vector<10x32xf32>
      %284 = tpu.matmul %282, %283, %cst_105 {dimension_numbers = #tpu.dot_dimension_numbers<[1], [0], [0], [1], [0, 0, 1, 1], [], []>} : vector<10x192xbf16>, vector<192x32xbf16>, vector<10x32xf32> -> vector<10x32xf32>
      %c0_106 = arith.constant 0 : index
      %c0_107 = arith.constant 0 : index
      %285 = vector.load %arg4[%c0_106, %c0_107] : memref<10x32xf32, #tpu.memory_space<vmem>>, vector<10x32xf32>
      %286 = arith.addf %284, %285 : vector<10x32xf32>
      %c0_108 = arith.constant 0 : index
      %c0_109 = arith.constant 0 : index
      %287 = vector.load %arg20[%c0_108, %c0_109] : memref<10x32xf32, #tpu.memory_space<vmem>>, vector<10x32xf32>
      tpu.vector_store %arg20[%c0_108, %c0_109], %286 {strides = array<i32>} : memref<10x32xf32, #tpu.memory_space<vmem>>, vector<10x32xf32>,
    } else {
    }
    %c0 = arith.constant 0 : index
    %c0_1 = arith.constant 0 : index
    %3 = vector.load %arg20[%c0, %c0_1] : memref<10x32xf32, #tpu.memory_space<vmem>>, vector<10x32xf32>
    %c0_2 = arith.constant 0 : index
    %c0_3 = arith.constant 0 : index
    %c0_4 = arith.constant 0 : index
    %4 = vector.load %arg7[%c0_2, %c0_3, %c0_4] : memref<1x1x32xf32, #tpu.memory_space<vmem>>, vector<1x1x32xf32>
    %5 = vector.shape_cast %4 : vector<1x1x32xf32> to vector<1x32xf32>
    %c0_5 = arith.constant 0 : index
    %c0_6 = arith.constant 0 : index
    %c0_7 = arith.constant 0 : index
    %6 = vector.load %arg8[%c0_5, %c0_6, %c0_7] : memref<1x1x32xf32, #tpu.memory_space<vmem>>, vector<1x1x32xf32>
    %7 = vector.shape_cast %6 : vector<1x1x32xf32> to vector<1x32xf32>
    %cst = arith.constant dense<0.000000e+00> : vector<10xf32>
    %8 = vector.multi_reduction <add>, %3, %cst [1] : vector<10x32xf32> to vector<10xf32>
    %9 = vector.shape_cast %8 : vector<10xf32> to vector<10x1xf32>
    %cst_8 = arith.constant 3.200000e+01 : f32
    %10 = vector.broadcast %cst_8 : f32 to vector<10x1xf32>
    %11 = arith.divf %9, %10 : vector<10x1xf32>
    %12 = vector.broadcast %11 : vector<10x1xf32> to vector<10x32xf32>
    %13 = arith.subf %3, %12 : vector<10x32xf32>
    %14 = arith.mulf %13, %13 : vector<10x32xf32>
    %cst_9 = arith.constant dense<0.000000e+00> : vector<10xf32>
    %15 = vector.multi_reduction <add>, %14, %cst_9 [1] : vector<10x32xf32> to vector<10xf32>
    %16 = vector.shape_cast %15 : vector<10xf32> to vector<10x1xf32>
    %cst_10 = arith.constant 3.200000e+01 : f32
    %17 = vector.broadcast %cst_10 : f32 to vector<10x1xf32>
    %18 = arith.divf %16, %17 : vector<10x1xf32>
    %19 = vector.broadcast %11 : vector<10x1xf32> to vector<10x32xf32>
    %20 = arith.subf %3, %19 : vector<10x32xf32>
    %cst_11 = arith.constant 9.99999997E-7 : f32
    %21 = vector.broadcast %cst_11 : f32 to vector<10x1xf32>
    %22 = arith.addf %18, %21 : vector<10x1xf32>
    %23 = math.rsqrt %22 : vector<10x1xf32>
    %24 = vector.broadcast %23 : vector<10x1xf32> to vector<10x32xf32>
    %25 = arith.mulf %20, %24 : vector<10x32xf32>
    %26 = vector.broadcast %5 : vector<1x32xf32> to vector<10x32xf32>
    %27 = arith.mulf %25, %26 : vector<10x32xf32>
    %28 = vector.broadcast %7 : vector<1x32xf32> to vector<10x32xf32>
    %29 = arith.addf %27, %28 : vector<10x32xf32>
    %c0_12 = arith.constant 0 : index
    %c0_13 = arith.constant 0 : index
    %c0_14 = arith.constant 0 : index
    %30 = vector.load %arg9[%c0_12, %c0_13, %c0_14] : memref<1x32x96xbf16, #tpu.memory_space<vmem>>, vector<1x32x96xbf16>
    %31 = vector.shape_cast %30 : vector<1x32x96xbf16> to vector<32x96xbf16>
    %32 = arith.truncf %29 : vector<10x32xf32> to vector<10x32xbf16>
    %cst_15 = arith.constant dense<0.000000e+00> : vector<10x96xf32>
    %33 = tpu.matmul %32, %31, %cst_15 {dimension_numbers = #tpu.dot_dimension_numbers<[1], [0], [0], [1], [0, 0, 1, 1], [], []>} : vector<10x32xbf16>, vector<32x96xbf16>, vector<10x96xf32> -> vector<10x96xf32>
    %c0_16 = arith.constant 0 : index
    %c0_17 = arith.constant 0 : index
    %c0_18 = arith.constant 0 : index
    %34 = vector.load %arg10[%c0_16, %c0_17, %c0_18] : memref<1x1x96xf32, #tpu.memory_space<vmem>>, vector<1x1x96xf32>
    %35 = vector.shape_cast %34 : vector<1x1x96xf32> to vector<1x96xf32>
    %36 = vector.broadcast %35 : vector<1x96xf32> to vector<10x96xf32>
    %37 = arith.addf %33, %36 : vector<10x96xf32>
    %38 = vector.extract_strided_slice %37 {offsets = [0, 0], sizes = [5, 8], strides = [1, 1]} : vector<10x96xf32> to vector<5x8xf32>
    %39 = vector.extract_strided_slice %37 {offsets = [0, 32], sizes = [5, 8], strides = [1, 1]} : vector<10x96xf32> to vector<5x8xf32>
    %40 = vector.extract_strided_slice %37 {offsets = [0, 64], sizes = [5, 8], strides = [1, 1]} : vector<10x96xf32> to vector<5x8xf32>
    %41 = arith.truncf %38 : vector<5x8xf32> to vector<5x8xbf16>
    %42 = arith.truncf %39 : vector<5x8xf32> to vector<5x8xbf16>
    %cst_19 = arith.constant dense<0.000000e+00> : vector<5x5xf32>
    %43 = tpu.matmul %41, %42, %cst_19 {dimension_numbers = #tpu.dot_dimension_numbers<[1], [1], [0], [0], [0, 0, 1, 0], [], []>} : vector<5x8xbf16>, vector<5x8xbf16>, vector<5x5xf32> -> vector<5x5xf32>
    %cst_20 = arith.constant 0.353553385 : f32
    %44 = vector.broadcast %cst_20 : f32 to vector<5x5xf32>
    %45 = arith.mulf %43, %44 : vector<5x5xf32>
    %cst_21 = arith.constant dense<0xFF800000> : vector<5xf32>
    %46 = vector.multi_reduction <maximumf>, %45, %cst_21 [1] : vector<5x5xf32> to vector<5xf32>
    %47 = vector.shape_cast %46 : vector<5xf32> to vector<5x1xf32>
    %48 = vector.broadcast %47 : vector<5x1xf32> to vector<5x5xf32>
    %49 = arith.subf %45, %48 : vector<5x5xf32>
    %50 = math.exp %49 : vector<5x5xf32>
    %cst_22 = arith.constant dense<0.000000e+00> : vector<5xf32>
    %51 = vector.multi_reduction <add>, %50, %cst_22 [1] : vector<5x5xf32> to vector<5xf32>
    %52 = vector.shape_cast %51 : vector<5xf32> to vector<5x1xf32>
    %53 = tpu.reciprocal %52 {approx = true} : vector<5x1xf32> -> vector<5x1xf32>
    %54 = vector.broadcast %53 : vector<5x1xf32> to vector<5x5xf32>
    %55 = arith.mulf %50, %54 : vector<5x5xf32>
    %56 = arith.truncf %55 : vector<5x5xf32> to vector<5x5xbf16>
    %57 = arith.truncf %40 : vector<5x8xf32> to vector<5x8xbf16>
    %cst_23 = arith.constant dense<0.000000e+00> : vector<5x8xf32>
    %58 = tpu.matmul %56, %57, %cst_23 {dimension_numbers = #tpu.dot_dimension_numbers<[1], [0], [0], [1], [0, 0, 1, 1], [], []>} : vector<5x5xbf16>, vector<5x8xbf16>, vector<5x8xf32> -> vector<5x8xf32>
    %59 = vector.extract_strided_slice %37 {offsets = [0, 8], sizes = [5, 8], strides = [1, 1]} : vector<10x96xf32> to vector<5x8xf32>
    %60 = vector.extract_strided_slice %37 {offsets = [0, 40], sizes = [5, 8], strides = [1, 1]} : vector<10x96xf32> to vector<5x8xf32>
    %61 = vector.extract_strided_slice %37 {offsets = [0, 72], sizes = [5, 8], strides = [1, 1]} : vector<10x96xf32> to vector<5x8xf32>
    %62 = arith.truncf %59 : vector<5x8xf32> to vector<5x8xbf16>
    %63 = arith.truncf %60 : vector<5x8xf32> to vector<5x8xbf16>
    %cst_24 = arith.constant dense<0.000000e+00> : vector<5x5xf32>
    %64 = tpu.matmul %62, %63, %cst_24 {dimension_numbers = #tpu.dot_dimension_numbers<[1], [1], [0], [0], [0, 0, 1, 0], [], []>} : vector<5x8xbf16>, vector<5x8xbf16>, vector<5x5xf32> -> vector<5x5xf32>
    %cst_25 = arith.constant 0.353553385 : f32
    %65 = vector.broadcast %cst_25 : f32 to vector<5x5xf32>
    %66 = arith.mulf %64, %65 : vector<5x5xf32>
    %cst_26 = arith.constant dense<0xFF800000> : vector<5xf32>
    %67 = vector.multi_reduction <maximumf>, %66, %cst_26 [1] : vector<5x5xf32> to vector<5xf32>
    %68 = vector.shape_cast %67 : vector<5xf32> to vector<5x1xf32>
    %69 = vector.broadcast %68 : vector<5x1xf32> to vector<5x5xf32>
    %70 = arith.subf %66, %69 : vector<5x5xf32>
    %71 = math.exp %70 : vector<5x5xf32>
    %cst_27 = arith.constant dense<0.000000e+00> : vector<5xf32>
    %72 = vector.multi_reduction <add>, %71, %cst_27 [1] : vector<5x5xf32> to vector<5xf32>
    %73 = vector.shape_cast %72 : vector<5xf32> to vector<5x1xf32>
    %74 = tpu.reciprocal %73 {approx = true} : vector<5x1xf32> -> vector<5x1xf32>
    %75 = vector.broadcast %74 : vector<5x1xf32> to vector<5x5xf32>
    %76 = arith.mulf %71, %75 : vector<5x5xf32>
    %77 = arith.truncf %76 : vector<5x5xf32> to vector<5x5xbf16>
    %78 = arith.truncf %61 : vector<5x8xf32> to vector<5x8xbf16>
    %cst_28 = arith.constant dense<0.000000e+00> : vector<5x8xf32>
    %79 = tpu.matmul %77, %78, %cst_28 {dimension_numbers = #tpu.dot_dimension_numbers<[1], [0], [0], [1], [0, 0, 1, 1], [], []>} : vector<5x5xbf16>, vector<5x8xbf16>, vector<5x8xf32> -> vector<5x8xf32>
    %80 = vector.extract_strided_slice %37 {offsets = [0, 16], sizes = [5, 8], strides = [1, 1]} : vector<10x96xf32> to vector<5x8xf32>
    %81 = vector.extract_strided_slice %37 {offsets = [0, 48], sizes = [5, 8], strides = [1, 1]} : vector<10x96xf32> to vector<5x8xf32>
    %82 = vector.extract_strided_slice %37 {offsets = [0, 80], sizes = [5, 8], strides = [1, 1]} : vector<10x96xf32> to vector<5x8xf32>
    %83 = arith.truncf %80 : vector<5x8xf32> to vector<5x8xbf16>
    %84 = arith.truncf %81 : vector<5x8xf32> to vector<5x8xbf16>
    %cst_29 = arith.constant dense<0.000000e+00> : vector<5x5xf32>
    %85 = tpu.matmul %83, %84, %cst_29 {dimension_numbers = #tpu.dot_dimension_numbers<[1], [1], [0], [0], [0, 0, 1, 0], [], []>} : vector<5x8xbf16>, vector<5x8xbf16>, vector<5x5xf32> -> vector<5x5xf32>
    %cst_30 = arith.constant 0.353553385 : f32
    %86 = vector.broadcast %cst_30 : f32 to vector<5x5xf32>
    %87 = arith.mulf %85, %86 : vector<5x5xf32>
    %cst_31 = arith.constant dense<0xFF800000> : vector<5xf32>
    %88 = vector.multi_reduction <maximumf>, %87, %cst_31 [1] : vector<5x5xf32> to vector<5xf32>
    %89 = vector.shape_cast %88 : vector<5xf32> to vector<5x1xf32>
    %90 = vector.broadcast %89 : vector<5x1xf32> to vector<5x5xf32>
    %91 = arith.subf %87, %90 : vector<5x5xf32>
    %92 = math.exp %91 : vector<5x5xf32>
    %cst_32 = arith.constant dense<0.000000e+00> : vector<5xf32>
    %93 = vector.multi_reduction <add>, %92, %cst_32 [1] : vector<5x5xf32> to vector<5xf32>
    %94 = vector.shape_cast %93 : vector<5xf32> to vector<5x1xf32>
    %95 = tpu.reciprocal %94 {approx = true} : vector<5x1xf32> -> vector<5x1xf32>
    %96 = vector.broadcast %95 : vector<5x1xf32> to vector<5x5xf32>
    %97 = arith.mulf %92, %96 : vector<5x5xf32>
    %98 = arith.truncf %97 : vector<5x5xf32> to vector<5x5xbf16>
    %99 = arith.truncf %82 : vector<5x8xf32> to vector<5x8xbf16>
    %cst_33 = arith.constant dense<0.000000e+00> : vector<5x8xf32>
    %100 = tpu.matmul %98, %99, %cst_33 {dimension_numbers = #tpu.dot_dimension_numbers<[1], [0], [0], [1], [0, 0, 1, 1], [], []>} : vector<5x5xbf16>, vector<5x8xbf16>, vector<5x8xf32> -> vector<5x8xf32>
    %101 = vector.extract_strided_slice %37 {offsets = [0, 24], sizes = [5, 8], strides = [1, 1]} : vector<10x96xf32> to vector<5x8xf32>
    %102 = vector.extract_strided_slice %37 {offsets = [0, 56], sizes = [5, 8], strides = [1, 1]} : vector<10x96xf32> to vector<5x8xf32>
    %103 = vector.extract_strided_slice %37 {offsets = [0, 88], sizes = [5, 8], strides = [1, 1]} : vector<10x96xf32> to vector<5x8xf32>
    %104 = arith.truncf %101 : vector<5x8xf32> to vector<5x8xbf16>
    %105 = arith.truncf %102 : vector<5x8xf32> to vector<5x8xbf16>
    %cst_34 = arith.constant dense<0.000000e+00> : vector<5x5xf32>
    %106 = tpu.matmul %104, %105, %cst_34 {dimension_numbers = #tpu.dot_dimension_numbers<[1], [1], [0], [0], [0, 0, 1, 0], [], []>} : vector<5x8xbf16>, vector<5x8xbf16>, vector<5x5xf32> -> vector<5x5xf32>
    %cst_35 = arith.constant 0.353553385 : f32
    %107 = vector.broadcast %cst_35 : f32 to vector<5x5xf32>
    %108 = arith.mulf %106, %107 : vector<5x5xf32>
    %cst_36 = arith.constant dense<0xFF800000> : vector<5xf32>
    %109 = vector.multi_reduction <maximumf>, %108, %cst_36 [1] : vector<5x5xf32> to vector<5xf32>
    %110 = vector.shape_cast %109 : vector<5xf32> to vector<5x1xf32>
    %111 = vector.broadcast %110 : vector<5x1xf32> to vector<5x5xf32>
    %112 = arith.subf %108, %111 : vector<5x5xf32>
    %113 = math.exp %112 : vector<5x5xf32>
    %cst_37 = arith.constant dense<0.000000e+00> : vector<5xf32>
    %114 = vector.multi_reduction <add>, %113, %cst_37 [1] : vector<5x5xf32> to vector<5xf32>
    %115 = vector.shape_cast %114 : vector<5xf32> to vector<5x1xf32>
    %116 = tpu.reciprocal %115 {approx = true} : vector<5x1xf32> -> vector<5x1xf32>
    %117 = vector.broadcast %116 : vector<5x1xf32> to vector<5x5xf32>
    %118 = arith.mulf %113, %117 : vector<5x5xf32>
    %119 = arith.truncf %118 : vector<5x5xf32> to vector<5x5xbf16>
    %120 = arith.truncf %103 : vector<5x8xf32> to vector<5x8xbf16>
    %cst_38 = arith.constant dense<0.000000e+00> : vector<5x8xf32>
    %121 = tpu.matmul %119, %120, %cst_38 {dimension_numbers = #tpu.dot_dimension_numbers<[1], [0], [0], [1], [0, 0, 1, 1], [], []>} : vector<5x5xbf16>, vector<5x8xbf16>, vector<5x8xf32> -> vector<5x8xf32>
    %122 = tpu.concatenate %58, %79, %100, %121 in 1 : vector<5x8xf32>, vector<5x8xf32>, vector<5x8xf32>, vector<5x8xf32> -> vector<5x32xf32>
    %123 = vector.extract_strided_slice %37 {offsets = [5, 0], sizes = [5, 8], strides = [1, 1]} : vector<10x96xf32> to vector<5x8xf32>
    %124 = vector.extract_strided_slice %37 {offsets = [5, 32], sizes = [5, 8], strides = [1, 1]} : vector<10x96xf32> to vector<5x8xf32>
    %125 = vector.extract_strided_slice %37 {offsets = [5, 64], sizes = [5, 8], strides = [1, 1]} : vector<10x96xf32> to vector<5x8xf32>
    %126 = arith.truncf %123 : vector<5x8xf32> to vector<5x8xbf16>
    %127 = arith.truncf %124 : vector<5x8xf32> to vector<5x8xbf16>
    %cst_39 = arith.constant dense<0.000000e+00> : vector<5x5xf32>
    %128 = tpu.matmul %126, %127, %cst_39 {dimension_numbers = #tpu.dot_dimension_numbers<[1], [1], [0], [0], [0, 0, 1, 0], [], []>} : vector<5x8xbf16>, vector<5x8xbf16>, vector<5x5xf32> -> vector<5x5xf32>
    %cst_40 = arith.constant 0.353553385 : f32
    %129 = vector.broadcast %cst_40 : f32 to vector<5x5xf32>
    %130 = arith.mulf %128, %129 : vector<5x5xf32>
    %cst_41 = arith.constant dense<0xFF800000> : vector<5xf32>
    %131 = vector.multi_reduction <maximumf>, %130, %cst_41 [1] : vector<5x5xf32> to vector<5xf32>
    %132 = vector.shape_cast %131 : vector<5xf32> to vector<5x1xf32>
    %133 = vector.broadcast %132 : vector<5x1xf32> to vector<5x5xf32>
    %134 = arith.subf %130, %133 : vector<5x5xf32>
    %135 = math.exp %134 : vector<5x5xf32>
    %cst_42 = arith.constant dense<0.000000e+00> : vector<5xf32>
    %136 = vector.multi_reduction <add>, %135, %cst_42 [1] : vector<5x5xf32> to vector<5xf32>
    %137 = vector.shape_cast %136 : vector<5xf32> to vector<5x1xf32>
    %138 = tpu.reciprocal %137 {approx = true} : vector<5x1xf32> -> vector<5x1xf32>
    %139 = vector.broadcast %138 : vector<5x1xf32> to vector<5x5xf32>
    %140 = arith.mulf %135, %139 : vector<5x5xf32>
    %141 = arith.truncf %140 : vector<5x5xf32> to vector<5x5xbf16>
    %142 = arith.truncf %125 : vector<5x8xf32> to vector<5x8xbf16>
    %cst_43 = arith.constant dense<0.000000e+00> : vector<5x8xf32>
    %143 = tpu.matmul %141, %142, %cst_43 {dimension_numbers = #tpu.dot_dimension_numbers<[1], [0], [0], [1], [0, 0, 1, 1], [], []>} : vector<5x5xbf16>, vector<5x8xbf16>, vector<5x8xf32> -> vector<5x8xf32>
    %144 = vector.extract_strided_slice %37 {offsets = [5, 8], sizes = [5, 8], strides = [1, 1]} : vector<10x96xf32> to vector<5x8xf32>
    %145 = vector.extract_strided_slice %37 {offsets = [5, 40], sizes = [5, 8], strides = [1, 1]} : vector<10x96xf32> to vector<5x8xf32>
    %146 = vector.extract_strided_slice %37 {offsets = [5, 72], sizes = [5, 8], strides = [1, 1]} : vector<10x96xf32> to vector<5x8xf32>
    %147 = arith.truncf %144 : vector<5x8xf32> to vector<5x8xbf16>
    %148 = arith.truncf %145 : vector<5x8xf32> to vector<5x8xbf16>
    %cst_44 = arith.constant dense<0.000000e+00> : vector<5x5xf32>
    %149 = tpu.matmul %147, %148, %cst_44 {dimension_numbers = #tpu.dot_dimension_numbers<[1], [1], [0], [0], [0, 0, 1, 0], [], []>} : vector<5x8xbf16>, vector<5x8xbf16>, vector<5x5xf32> -> vector<5x5xf32>
    %cst_45 = arith.constant 0.353553385 : f32
    %150 = vector.broadcast %cst_45 : f32 to vector<5x5xf32>
    %151 = arith.mulf %149, %150 : vector<5x5xf32>
    %cst_46 = arith.constant dense<0xFF800000> : vector<5xf32>
    %152 = vector.multi_reduction <maximumf>, %151, %cst_46 [1] : vector<5x5xf32> to vector<5xf32>
    %153 = vector.shape_cast %152 : vector<5xf32> to vector<5x1xf32>
    %154 = vector.broadcast %153 : vector<5x1xf32> to vector<5x5xf32>
    %155 = arith.subf %151, %154 : vector<5x5xf32>
    %156 = math.exp %155 : vector<5x5xf32>
    %cst_47 = arith.constant dense<0.000000e+00> : vector<5xf32>
    %157 = vector.multi_reduction <add>, %156, %cst_47 [1] : vector<5x5xf32> to vector<5xf32>
    %158 = vector.shape_cast %157 : vector<5xf32> to vector<5x1xf32>
    %159 = tpu.reciprocal %158 {approx = true} : vector<5x1xf32> -> vector<5x1xf32>
    %160 = vector.broadcast %159 : vector<5x1xf32> to vector<5x5xf32>
    %161 = arith.mulf %156, %160 : vector<5x5xf32>
    %162 = arith.truncf %161 : vector<5x5xf32> to vector<5x5xbf16>
    %163 = arith.truncf %146 : vector<5x8xf32> to vector<5x8xbf16>
    %cst_48 = arith.constant dense<0.000000e+00> : vector<5x8xf32>
    %164 = tpu.matmul %162, %163, %cst_48 {dimension_numbers = #tpu.dot_dimension_numbers<[1], [0], [0], [1], [0, 0, 1, 1], [], []>} : vector<5x5xbf16>, vector<5x8xbf16>, vector<5x8xf32> -> vector<5x8xf32>
    %165 = vector.extract_strided_slice %37 {offsets = [5, 16], sizes = [5, 8], strides = [1, 1]} : vector<10x96xf32> to vector<5x8xf32>
    %166 = vector.extract_strided_slice %37 {offsets = [5, 48], sizes = [5, 8], strides = [1, 1]} : vector<10x96xf32> to vector<5x8xf32>
    %167 = vector.extract_strided_slice %37 {offsets = [5, 80], sizes = [5, 8], strides = [1, 1]} : vector<10x96xf32> to vector<5x8xf32>
    %168 = arith.truncf %165 : vector<5x8xf32> to vector<5x8xbf16>
    %169 = arith.truncf %166 : vector<5x8xf32> to vector<5x8xbf16>
    %cst_49 = arith.constant dense<0.000000e+00> : vector<5x5xf32>
    %170 = tpu.matmul %168, %169, %cst_49 {dimension_numbers = #tpu.dot_dimension_numbers<[1], [1], [0], [0], [0, 0, 1, 0], [], []>} : vector<5x8xbf16>, vector<5x8xbf16>, vector<5x5xf32> -> vector<5x5xf32>
    %cst_50 = arith.constant 0.353553385 : f32
    %171 = vector.broadcast %cst_50 : f32 to vector<5x5xf32>
    %172 = arith.mulf %170, %171 : vector<5x5xf32>
    %cst_51 = arith.constant dense<0xFF800000> : vector<5xf32>
    %173 = vector.multi_reduction <maximumf>, %172, %cst_51 [1] : vector<5x5xf32> to vector<5xf32>
    %174 = vector.shape_cast %173 : vector<5xf32> to vector<5x1xf32>
    %175 = vector.broadcast %174 : vector<5x1xf32> to vector<5x5xf32>
    %176 = arith.subf %172, %175 : vector<5x5xf32>
    %177 = math.exp %176 : vector<5x5xf32>
    %cst_52 = arith.constant dense<0.000000e+00> : vector<5xf32>
    %178 = vector.multi_reduction <add>, %177, %cst_52 [1] : vector<5x5xf32> to vector<5xf32>
    %179 = vector.shape_cast %178 : vector<5xf32> to vector<5x1xf32>
    %180 = tpu.reciprocal %179 {approx = true} : vector<5x1xf32> -> vector<5x1xf32>
    %181 = vector.broadcast %180 : vector<5x1xf32> to vector<5x5xf32>
    %182 = arith.mulf %177, %181 : vector<5x5xf32>
    %183 = arith.truncf %182 : vector<5x5xf32> to vector<5x5xbf16>
    %184 = arith.truncf %167 : vector<5x8xf32> to vector<5x8xbf16>
    %cst_53 = arith.constant dense<0.000000e+00> : vector<5x8xf32>
    %185 = tpu.matmul %183, %184, %cst_53 {dimension_numbers = #tpu.dot_dimension_numbers<[1], [0], [0], [1], [0, 0, 1, 1], [], []>} : vector<5x5xbf16>, vector<5x8xbf16>, vector<5x8xf32> -> vector<5x8xf32>
    %186 = vector.extract_strided_slice %37 {offsets = [5, 24], sizes = [5, 8], strides = [1, 1]} : vector<10x96xf32> to vector<5x8xf32>
    %187 = vector.extract_strided_slice %37 {offsets = [5, 56], sizes = [5, 8], strides = [1, 1]} : vector<10x96xf32> to vector<5x8xf32>
    %188 = vector.extract_strided_slice %37 {offsets = [5, 88], sizes = [5, 8], strides = [1, 1]} : vector<10x96xf32> to vector<5x8xf32>
    %189 = arith.truncf %186 : vector<5x8xf32> to vector<5x8xbf16>
    %190 = arith.truncf %187 : vector<5x8xf32> to vector<5x8xbf16>
    %cst_54 = arith.constant dense<0.000000e+00> : vector<5x5xf32>
    %191 = tpu.matmul %189, %190, %cst_54 {dimension_numbers = #tpu.dot_dimension_numbers<[1], [1], [0], [0], [0, 0, 1, 0], [], []>} : vector<5x8xbf16>, vector<5x8xbf16>, vector<5x5xf32> -> vector<5x5xf32>
    %cst_55 = arith.constant 0.353553385 : f32
    %192 = vector.broadcast %cst_55 : f32 to vector<5x5xf32>
    %193 = arith.mulf %191, %192 : vector<5x5xf32>
    %cst_56 = arith.constant dense<0xFF800000> : vector<5xf32>
    %194 = vector.multi_reduction <maximumf>, %193, %cst_56 [1] : vector<5x5xf32> to vector<5xf32>
    %195 = vector.shape_cast %194 : vector<5xf32> to vector<5x1xf32>
    %196 = vector.broadcast %195 : vector<5x1xf32> to vector<5x5xf32>
    %197 = arith.subf %193, %196 : vector<5x5xf32>
    %198 = math.exp %197 : vector<5x5xf32>
    %cst_57 = arith.constant dense<0.000000e+00> : vector<5xf32>
    %199 = vector.multi_reduction <add>, %198, %cst_57 [1] : vector<5x5xf32> to vector<5xf32>
    %200 = vector.shape_cast %199 : vector<5xf32> to vector<5x1xf32>
    %201 = tpu.reciprocal %200 {approx = true} : vector<5x1xf32> -> vector<5x1xf32>
    %202 = vector.broadcast %201 : vector<5x1xf32> to vector<5x5xf32>
    %203 = arith.mulf %198, %202 : vector<5x5xf32>
    %204 = arith.truncf %203 : vector<5x5xf32> to vector<5x5xbf16>
    %205 = arith.truncf %188 : vector<5x8xf32> to vector<5x8xbf16>
    %cst_58 = arith.constant dense<0.000000e+00> : vector<5x8xf32>
    %206 = tpu.matmul %204, %205, %cst_58 {dimension_numbers = #tpu.dot_dimension_numbers<[1], [0], [0], [1], [0, 0, 1, 1], [], []>} : vector<5x5xbf16>, vector<5x8xbf16>, vector<5x8xf32> -> vector<5x8xf32>
    %207 = tpu.concatenate %143, %164, %185, %206 in 1 : vector<5x8xf32>, vector<5x8xf32>, vector<5x8xf32>, vector<5x8xf32> -> vector<5x32xf32>
    %208 = tpu.concatenate %122, %207 in 0 : vector<5x32xf32>, vector<5x32xf32> -> vector<10x32xf32>
    %c0_59 = arith.constant 0 : index
    %c0_60 = arith.constant 0 : index
    %c0_61 = arith.constant 0 : index
    %209 = vector.load %arg11[%c0_59, %c0_60, %c0_61] : memref<1x32x32xbf16, #tpu.memory_space<vmem>>, vector<1x32x32xbf16>
    %210 = vector.shape_cast %209 : vector<1x32x32xbf16> to vector<32x32xbf16>
    %211 = arith.truncf %208 : vector<10x32xf32> to vector<10x32xbf16>
    %cst_62 = arith.constant dense<0.000000e+00> : vector<10x32xf32>
    %212 = tpu.matmul %211, %210, %cst_62 {dimension_numbers = #tpu.dot_dimension_numbers<[1], [0], [0], [1], [0, 0, 1, 1], [], []>} : vector<10x32xbf16>, vector<32x32xbf16>, vector<10x32xf32> -> vector<10x32xf32>
    %213 = arith.addf %3, %212 : vector<10x32xf32>
    %c0_63 = arith.constant 0 : index
    %c0_64 = arith.constant 0 : index
    %c0_65 = arith.constant 0 : index
    %214 = vector.load %arg12[%c0_63, %c0_64, %c0_65] : memref<1x1x32xf32, #tpu.memory_space<vmem>>, vector<1x1x32xf32>
    %215 = vector.shape_cast %214 : vector<1x1x32xf32> to vector<1x32xf32>
    %216 = vector.broadcast %215 : vector<1x32xf32> to vector<10x32xf32>
    %217 = arith.addf %213, %216 : vector<10x32xf32>
    %c0_66 = arith.constant 0 : index
    %c0_67 = arith.constant 0 : index
    %c0_68 = arith.constant 0 : index
    %218 = vector.load %arg13[%c0_66, %c0_67, %c0_68] : memref<1x1x32xf32, #tpu.memory_space<vmem>>, vector<1x1x32xf32>
    %219 = vector.shape_cast %218 : vector<1x1x32xf32> to vector<1x32xf32>
    %c0_69 = arith.constant 0 : index
    %c0_70 = arith.constant 0 : index
    %c0_71 = arith.constant 0 : index
    %220 = vector.load %arg14[%c0_69, %c0_70, %c0_71] : memref<1x1x32xf32, #tpu.memory_space<vmem>>, vector<1x1x32xf32>
    %221 = vector.shape_cast %220 : vector<1x1x32xf32> to vector<1x32xf32>
    %cst_72 = arith.constant dense<0.000000e+00> : vector<10xf32>
    %222 = vector.multi_reduction <add>, %217, %cst_72 [1] : vector<10x32xf32> to vector<10xf32>
    %223 = vector.shape_cast %222 : vector<10xf32> to vector<10x1xf32>
    %cst_73 = arith.constant 3.200000e+01 : f32
    %224 = vector.broadcast %cst_73 : f32 to vector<10x1xf32>
    %225 = arith.divf %223, %224 : vector<10x1xf32>
    %226 = vector.broadcast %225 : vector<10x1xf32> to vector<10x32xf32>
    %227 = arith.subf %217, %226 : vector<10x32xf32>
    %228 = arith.mulf %227, %227 : vector<10x32xf32>
    %cst_74 = arith.constant dense<0.000000e+00> : vector<10xf32>
    %229 = vector.multi_reduction <add>, %228, %cst_74 [1] : vector<10x32xf32> to vector<10xf32>
    %230 = vector.shape_cast %229 : vector<10xf32> to vector<10x1xf32>
    %cst_75 = arith.constant 3.200000e+01 : f32
    %231 = vector.broadcast %cst_75 : f32 to vector<10x1xf32>
    %232 = arith.divf %230, %231 : vector<10x1xf32>
    %233 = vector.broadcast %225 : vector<10x1xf32> to vector<10x32xf32>
    %234 = arith.subf %217, %233 : vector<10x32xf32>
    %cst_76 = arith.constant 9.99999997E-7 : f32
    %235 = vector.broadcast %cst_76 : f32 to vector<10x1xf32>
    %236 = arith.addf %232, %235 : vector<10x1xf32>
    %237 = math.rsqrt %236 : vector<10x1xf32>
    %238 = vector.broadcast %237 : vector<10x1xf32> to vector<10x32xf32>
    %239 = arith.mulf %234, %238 : vector<10x32xf32>
    %240 = vector.broadcast %219 : vector<1x32xf32> to vector<10x32xf32>
    %241 = arith.mulf %239, %240 : vector<10x32xf32>
    %242 = vector.broadcast %221 : vector<1x32xf32> to vector<10x32xf32>
    %243 = arith.addf %241, %242 : vector<10x32xf32>
    %c0_77 = arith.constant 0 : index
    %c0_78 = arith.constant 0 : index
    %c0_79 = arith.constant 0 : index
    %244 = vector.load %arg15[%c0_77, %c0_78, %c0_79] : memref<1x32x128xbf16, #tpu.memory_space<vmem>>, vector<1x32x128xbf16>
    %245 = vector.shape_cast %244 : vector<1x32x128xbf16> to vector<32x128xbf16>
    %246 = arith.truncf %243 : vector<10x32xf32> to vector<10x32xbf16>
    %cst_80 = arith.constant dense<0.000000e+00> : vector<10x128xf32>
    %247 = tpu.matmul %246, %245, %cst_80 {dimension_numbers = #tpu.dot_dimension_numbers<[1], [0], [0], [1], [0, 0, 1, 1], [], []>} : vector<10x32xbf16>, vector<32x128xbf16>, vector<10x128xf32> -> vector<10x128xf32>
    %c0_81 = arith.constant 0 : index
    %c0_82 = arith.constant 0 : index
    %c0_83 = arith.constant 0 : index
    %248 = vector.load %arg16[%c0_81, %c0_82, %c0_83] : memref<1x1x128xf32, #tpu.memory_space<vmem>>, vector<1x1x128xf32>
    %249 = vector.shape_cast %248 : vector<1x1x128xf32> to vector<1x128xf32>
    %250 = vector.broadcast %249 : vector<1x128xf32> to vector<10x128xf32>
    %251 = arith.addf %247, %250 : vector<10x128xf32>
    %252 = arith.mulf %251, %251 : vector<10x128xf32>
    %253 = arith.mulf %251, %252 : vector<10x128xf32>
    %cst_84 = arith.constant 4.471500e-02 : f32
    %254 = vector.broadcast %cst_84 : f32 to vector<10x128xf32>
    %255 = arith.mulf %254, %253 : vector<10x128xf32>
    %256 = arith.addf %251, %255 : vector<10x128xf32>
    %cst_85 = arith.constant 0.797884583 : f32
    %257 = vector.broadcast %cst_85 : f32 to vector<10x128xf32>
    %258 = arith.mulf %257, %256 : vector<10x128xf32>
    %259 = math.tanh %258 : vector<10x128xf32>
    %cst_86 = arith.constant 1.000000e+00 : f32
    %260 = vector.broadcast %cst_86 : f32 to vector<10x128xf32>
    %261 = arith.addf %260, %259 : vector<10x128xf32>
    %cst_87 = arith.constant 5.000000e-01 : f32
    %262 = vector.broadcast %cst_87 : f32 to vector<10x128xf32>
    %263 = arith.mulf %262, %261 : vector<10x128xf32>
    %264 = arith.mulf %251, %263 : vector<10x128xf32>
    %c0_88 = arith.constant 0 : index
    %c0_89 = arith.constant 0 : index
    %c0_90 = arith.constant 0 : index
    %265 = vector.load %arg17[%c0_88, %c0_89, %c0_90] : memref<1x128x32xbf16, #tpu.memory_space<vmem>>, vector<1x128x32xbf16>
    %266 = vector.shape_cast %265 : vector<1x128x32xbf16> to vector<128x32xbf16>
    %267 = arith.truncf %264 : vector<10x128xf32> to vector<10x128xbf16>
    %cst_91 = arith.constant dense<0.000000e+00> : vector<10x32xf32>
    %268 = tpu.matmul %267, %266, %cst_91 {dimension_numbers = #tpu.dot_dimension_numbers<[1], [0], [0], [1], [0, 0, 1, 1], [], []>} : vector<10x128xbf16>, vector<128x32xbf16>, vector<10x32xf32> -> vector<10x32xf32>
    %269 = arith.addf %217, %268 : vector<10x32xf32>
    %c0_92 = arith.constant 0 : index
    %c0_93 = arith.constant 0 : index
    %c0_94 = arith.constant 0 : index
    %270 = vector.load %arg18[%c0_92, %c0_93, %c0_94] : memref<1x1x32xf32, #tpu.memory_space<vmem>>, vector<1x1x32xf32>
    %271 = vector.shape_cast %270 : vector<1x1x32xf32> to vector<1x32xf32>
    %272 = vector.broadcast %271 : vector<1x32xf32> to vector<10x32xf32>
    %273 = arith.addf %269, %272 : vector<10x32xf32>
    %c0_95 = arith.constant 0 : index
    %c0_96 = arith.constant 0 : index
    %274 = vector.load %arg20[%c0_95, %c0_96] : memref<10x32xf32, #tpu.memory_space<vmem>>, vector<10x32xf32>
    tpu.vector_store %arg20[%c0_95, %c0_96], %273 {strides = array<i32>} : memref<10x32xf32, #tpu.memory_space<vmem>>, vector<10x32xf32>,
    %c0_i32_97 = arith.constant 0 : i32
    %275 = arith.cmpi eq, %arg1, %c0_i32_97 : i32
    %276 = arith.extui %275 : i1 to i32
    %c0_i32_98 = arith.constant 0 : i32
    %277 = arith.cmpi ne, %276, %c0_i32_98 : i32
    scf.if %277 {
      %c0_100 = arith.constant 0 : index
      %c0_101 = arith.constant 0 : index
      %281 = vector.load %arg5[%c0_100, %c0_101] : memref<1x32xf32, #tpu.memory_space<vmem>>, vector<1x32xf32>
      %c0_102 = arith.constant 0 : index
      %c0_103 = arith.constant 0 : index
      %282 = vector.load %arg6[%c0_102, %c0_103] : memref<1x32xf32, #tpu.memory_space<vmem>>, vector<1x32xf32>
      %cst_104 = arith.constant dense<0.000000e+00> : vector<10xf32>
      %283 = vector.multi_reduction <add>, %273, %cst_104 [1] : vector<10x32xf32> to vector<10xf32>
      %284 = vector.shape_cast %283 : vector<10xf32> to vector<10x1xf32>
      %cst_105 = arith.constant 3.200000e+01 : f32
      %285 = vector.broadcast %cst_105 : f32 to vector<10x1xf32>
      %286 = arith.divf %284, %285 : vector<10x1xf32>
      %287 = vector.broadcast %286 : vector<10x1xf32> to vector<10x32xf32>
      %288 = arith.subf %273, %287 : vector<10x32xf32>
      %289 = arith.mulf %288, %288 : vector<10x32xf32>
      %cst_106 = arith.constant dense<0.000000e+00> : vector<10xf32>
      %290 = vector.multi_reduction <add>, %289, %cst_106 [1] : vector<10x32xf32> to vector<10xf32>
      %291 = vector.shape_cast %290 : vector<10xf32> to vector<10x1xf32>
      %cst_107 = arith.constant 3.200000e+01 : f32
      %292 = vector.broadcast %cst_107 : f32 to vector<10x1xf32>
      %293 = arith.divf %291, %292 : vector<10x1xf32>
      %294 = vector.broadcast %286 : vector<10x1xf32> to vector<10x32xf32>
      %295 = arith.subf %273, %294 : vector<10x32xf32>
      %cst_108 = arith.constant 9.99999997E-7 : f32
      %296 = vector.broadcast %cst_108 : f32 to vector<10x1xf32>
      %297 = arith.addf %293, %296 : vector<10x1xf32>
      %298 = math.rsqrt %297 : vector<10x1xf32>
      %299 = vector.broadcast %298 : vector<10x1xf32> to vector<10x32xf32>
      %300 = arith.mulf %295, %299 : vector<10x32xf32>
      %301 = vector.broadcast %281 : vector<1x32xf32> to vector<10x32xf32>
      %302 = arith.mulf %300, %301 : vector<10x32xf32>
      %303 = vector.broadcast %282 : vector<1x32xf32> to vector<10x32xf32>
      %304 = arith.addf %302, %303 : vector<10x32xf32>
      %c0_109 = arith.constant 0 : index
      %c0_110 = arith.constant 0 : index
      %c0_111 = arith.constant 0 : index
      %305 = vector.load %arg19[%c0_109, %c0_110, %c0_111] : memref<1x10x64xf32, #tpu.memory_space<vmem>>, vector<1x10x32xf32>
      %306 = vector.shape_cast %305 : vector<1x10x32xf32> to vector<10x32xf32>
      %307 = vector.shape_cast %304 : vector<10x32xf32> to vector<1x10x32xf32>
      tpu.vector_store %arg19[%c0_109, %c0_110, %c0_111], %307 {strides = array<i32>} : memref<1x10x64xf32, #tpu.memory_space<vmem>>, vector<1x10x32xf32>,
    } else {
    }
    %c1_i32 = arith.constant 1 : i32
    %278 = arith.cmpi eq, %arg1, %c1_i32 : i32
    %279 = arith.extui %278 : i1 to i32
    %c0_i32_99 = arith.constant 0 : i32
    %280 = arith.cmpi ne, %279, %c0_i32_99 : i32
    scf.if %280 {
      %c0_100 = arith.constant 0 : index
      %c0_101 = arith.constant 0 : index
      %281 = vector.load %arg5[%c0_100, %c0_101] : memref<1x32xf32, #tpu.memory_space<vmem>>, vector<1x32xf32>
      %c0_102 = arith.constant 0 : index
      %c0_103 = arith.constant 0 : index
      %282 = vector.load %arg6[%c0_102, %c0_103] : memref<1x32xf32, #tpu.memory_space<vmem>>, vector<1x32xf32>
      %cst_104 = arith.constant dense<0.000000e+00> : vector<10xf32>
      %283 = vector.multi_reduction <add>, %273, %cst_104 [1] : vector<10x32xf32> to vector<10xf32>
      %284 = vector.shape_cast %283 : vector<10xf32> to vector<10x1xf32>
      %cst_105 = arith.constant 3.200000e+01 : f32
      %285 = vector.broadcast %cst_105 : f32 to vector<10x1xf32>
      %286 = arith.divf %284, %285 : vector<10x1xf32>
      %287 = vector.broadcast %286 : vector<10x1xf32> to vector<10x32xf32>
      %288 = arith.subf %273, %287 : vector<10x32xf32>
      %289 = arith.mulf %288, %288 : vector<10x32xf32>
      %cst_106 = arith.constant dense<0.000000e+00> : vector<10xf32>
      %290 = vector.multi_reduction <add>, %289, %cst_106 [1] : vector<10x32xf32> to vector<10xf32>
      %291 = vector.shape_cast %290 : vector<10xf32> to vector<10x1xf32>
      %cst_107 = arith.constant 3.200000e+01 : f32
      %292 = vector.broadcast %cst_107 : f32 to vector<10x1xf32>
      %293 = arith.divf %291, %292 : vector<10x1xf32>
      %294 = vector.broadcast %286 : vector<10x1xf32> to vector<10x32xf32>
      %295 = arith.subf %273, %294 : vector<10x32xf32>
      %cst_108 = arith.constant 9.99999997E-7 : f32
      %296 = vector.broadcast %cst_108 : f32 to vector<10x1xf32>
      %297 = arith.addf %293, %296 : vector<10x1xf32>
      %298 = math.rsqrt %297 : vector<10x1xf32>
      %299 = vector.broadcast %298 : vector<10x1xf32> to vector<10x32xf32>
      %300 = arith.mulf %295, %299 : vector<10x32xf32>
      %301 = vector.broadcast %281 : vector<1x32xf32> to vector<10x32xf32>
      %302 = arith.mulf %300, %301 : vector<10x32xf32>
      %303 = vector.broadcast %282 : vector<1x32xf32> to vector<10x32xf32>
      %304 = arith.addf %302, %303 : vector<10x32xf32>
      %c0_109 = arith.constant 0 : index
      %c0_110 = arith.constant 0 : index
      %c32 = arith.constant 32 : index
      %305 = vector.load %arg19[%c0_109, %c0_110, %c32] : memref<1x10x64xf32, #tpu.memory_space<vmem>>, vector<1x10x32xf32>
      %306 = vector.shape_cast %305 : vector<1x10x32xf32> to vector<10x32xf32>
      %307 = vector.shape_cast %304 : vector<10x32xf32> to vector<1x10x32xf32>
      tpu.vector_store %arg19[%c0_109, %c0_110, %c32], %307 {strides = array<i32>} : memref<1x10x64xf32, #tpu.memory_space<vmem>>, vector<1x10x32xf32>,
    } else {
    }
    return
  }
  func.func @transform_0(%arg0: i32, %arg1: i32) -> (i32, i32, i32) {
    %c0_i32 = arith.constant 0 : i32
    %c0_i32_0 = arith.constant 0 : i32
    %c0_i32_1 = arith.constant 0 : i32
    return %arg0, %c0_i32, %c0_i32_0 : i32, i32, i32
  }
  func.func @transform_1(%arg0: i32, %arg1: i32) -> (i32, i32) {
    %c0_i32 = arith.constant 0 : i32
    %c0_i32_0 = arith.constant 0 : i32
    %c0_i32_1 = arith.constant 0 : i32
    return %c0_i32, %c0_i32_0 : i32, i32
  }
  func.func @transform_2(%arg0: i32, %arg1: i32) -> (i32, i32) {
    %c0_i32 = arith.constant 0 : i32
    %c0_i32_0 = arith.constant 0 : i32
    %c0_i32_1 = arith.constant 0 : i32
    return %c0_i32, %c0_i32_0 : i32, i32
  }
  func.func @transform_3(%arg0: i32, %arg1: i32) -> (i32, i32) {
    %c0_i32 = arith.constant 0 : i32
    %c0_i32_0 = arith.constant 0 : i32
    %c0_i32_1 = arith.constant 0 : i32
    return %c0_i32, %c0_i32_0 : i32, i32
  }
  func.func @transform_4(%arg0: i32, %arg1: i32) -> (i32, i32) {
    %c0_i32 = arith.constant 0 : i32
    %c0_i32_0 = arith.constant 0 : i32
    %c0_i32_1 = arith.constant 0 : i32
    return %c0_i32, %c0_i32_0 : i32, i32
  }
  func.func @transform_5(%arg0: i32, %arg1: i32) -> (i32, i32, i32) {
    %c0_i32 = arith.constant 0 : i32
    %c0_i32_0 = arith.constant 0 : i32
    %c0_i32_1 = arith.constant 0 : i32
    return %arg1, %c0_i32, %c0_i32_0 : i32, i32, i32
  }
  func.func @transform_6(%arg0: i32, %arg1: i32) -> (i32, i32, i32) {
    %c0_i32 = arith.constant 0 : i32
    %c0_i32_0 = arith.constant 0 : i32
    %c0_i32_1 = arith.constant 0 : i32
    return %arg1, %c0_i32, %c0_i32_0 : i32, i32, i32
  }
  func.func @transform_7(%arg0: i32, %arg1: i32) -> (i32, i32, i32) {
    %c0_i32 = arith.constant 0 : i32
    %c0_i32_0 = arith.constant 0 : i32
    %c0_i32_1 = arith.constant 0 : i32
    return %arg1, %c0_i32, %c0_i32_0 : i32, i32, i32
  }
  func.func @transform_8(%arg0: i32, %arg1: i32) -> (i32, i32, i32) {
    %c0_i32 = arith.constant 0 : i32
    %c0_i32_0 = arith.constant 0 : i32
    %c0_i32_1 = arith.constant 0 : i32
    return %arg1, %c0_i32, %c0_i32_0 : i32, i32, i32
  }
  func.func @transform_9(%arg0: i32, %arg1: i32) -> (i32, i32, i32) {
    %c0_i32 = arith.constant 0 : i32
    %c0_i32_0 = arith.constant 0 : i32
    %c0_i32_1 = arith.constant 0 : i32
    return %arg1, %c0_i32, %c0_i32_0 : i32, i32, i32
  }
  func.func @transform_10(%arg0: i32, %arg1: i32) -> (i32, i32, i32) {
    %c0_i32 = arith.constant 0 : i32
    %c0_i32_0 = arith.constant 0 : i32
    %c0_i32_1 = arith.constant 0 : i32
    return %arg1, %c0_i32, %c0_i32_0 : i32, i32, i32
  }
  func.func @transform_11(%arg0: i32, %arg1: i32) -> (i32, i32, i32) {
    %c0_i32 = arith.constant 0 : i32
    %c0_i32_0 = arith.constant 0 : i32
    %c0_i32_1 = arith.constant 0 : i32
    return %arg1, %c0_i32, %c0_i32_0 : i32, i32, i32
  }
  func.func @transform_12(%arg0: i32, %arg1: i32) -> (i32, i32, i32) {
    %c0_i32 = arith.constant 0 : i32
    %c0_i32_0 = arith.constant 0 : i32
    %c0_i32_1 = arith.constant 0 : i32
    return %arg1, %c0_i32, %c0_i32_0 : i32, i32, i32
  }
  func.func @transform_13(%arg0: i32, %arg1: i32) -> (i32, i32, i32) {
    %c0_i32 = arith.constant 0 : i32
    %c0_i32_0 = arith.constant 0 : i32
    %c0_i32_1 = arith.constant 0 : i32
    return %arg1, %c0_i32, %c0_i32_0 : i32, i32, i32
  }
  func.func @transform_14(%arg0: i32, %arg1: i32) -> (i32, i32, i32) {
    %c0_i32 = arith.constant 0 : i32
    %c0_i32_0 = arith.constant 0 : i32
    %c0_i32_1 = arith.constant 0 : i32
    return %arg1, %c0_i32, %c0_i32_0 : i32, i32, i32
  }
  func.func @transform_15(%arg0: i32, %arg1: i32) -> (i32, i32, i32) {
    %c0_i32 = arith.constant 0 : i32
    %c0_i32_0 = arith.constant 0 : i32
    %c0_i32_1 = arith.constant 0 : i32
    return %arg1, %c0_i32, %c0_i32_0 : i32, i32, i32
  }
  func.func @transform_16(%arg0: i32, %arg1: i32) -> (i32, i32, i32) {
    %c0_i32 = arith.constant 0 : i32
    %c0_i32_0 = arith.constant 0 : i32
    %c0_i32_1 = arith.constant 0 : i32
    return %arg1, %c0_i32, %c0_i32_0 : i32, i32, i32
  }
  func.func @transform_17(%arg0: i32, %arg1: i32) -> (i32, i32, i32) {
    %c0_i32 = arith.constant 0 : i32
    %c0_i32_0 = arith.constant 0 : i32
    %c0_i32_1 = arith.constant 0 : i32
    return %arg0, %c0_i32, %c0_i32_0 : i32, i32, i32
  }
}

</mosaic_0001>

<bundles_post_ra>
// kernel: tile.9
= control target key start
LH: loop header
LB: loop body
LE: loop exit
PB: predicated region body
PF: predicated region fallthrough
CT: control target
= control target key end

     0   :  { %vm3_vm0 = vcmask 261120   ;;  %s34_s0 = inlined_call_operand.vmem [shape: f32[2,5,32], index: 0, kind: input, shape index: {}]   ;;  %s35_s1 = inlined_call_operand.vmem [shape: f32[10,32], index: 1, kind: output, shape index: {}]  }
   0x1   :  { %v2_v0 = vld [vmem:[%s34_s0] sm:$0x1f]   ;;  %v10_v1 = vld [vmem:[%s34_s0 + $0x8] sm:$0x1f]  }
   0x2   :  { %4 = vst.msk [vmem:[%s35_s1] sm:$0x1f] %vm3_vm0, %v2_v0   ;;  %11 = vst.msk [vmem:[%s35_s1 + $0x5] sm:$0x1f] %vm3_vm0, %v10_v1  }

// kernel: feature_extractor_vit_forward.1
= control target key start
LH: loop header
LB: loop body
LE: loop exit
PB: predicated region body
PF: predicated region fallthrough
CT: control target
= control target key end

     0   :  { %s3126_s24 = smov 0   ;;  %s3128_s25 = smov 0   ;;  %s3591_s0 = inlined_call_operand.vmem [shape: bf16[1,10,192], index: 0, kind: input, shape index: {}]   ;;  %s3592_s1 = inlined_call_operand.vmem [shape: bf16[192,32], index: 1, kind: input, shape index: {}]   ;;  %s3593_s2 = inlined_call_operand.vmem [shape: f32[10,32], index: 2, kind: input, shape index: {}]   ;;  %s3594_s3 = inlined_call_operand.vmem [shape: f32[1,32], index: 3, kind: input, shape index: {}]   ;;  %s3595_s4 = inlined_call_operand.vmem [shape: f32[1,32], index: 4, kind: input, shape index: {}]   ;;  %s3596_s5 = inlined_call_operand.vmem [shape: f32[2,1,32], index: 5, kind: input, shape index: {}]   ;;  %s3597_s6 = inlined_call_operand.vmem [shape: f32[2,1,32], index: 6, kind: input, shape index: {}]   ;;  %s3598_s7 = inlined_call_operand.vmem [shape: bf16[2,32,96], index: 7, kind: input, shape index: {}]   ;;  %s3599_s8 = inlined_call_operand.vmem [shape: f32[2,1,96], index: 8, kind: input, shape index: {}]   ;;  %s3600_s9 = inlined_call_operand.vmem [shape: bf16[2,32,32], index: 9, kind: input, shape index: {}]   ;;  %s3601_s10 = inlined_call_operand.vmem [shape: f32[2,1,32], index: 10, kind: input, shape index: {}]   ;;  %s3602_s11 = inlined_call_operand.vmem [shape: f32[2,1,32], index: 11, kind: input, shape index: {}]   ;;  %s3603_s12 = inlined_call_operand.vmem [shape: f32[2,1,32], index: 12, kind: input, shape index: {}]   ;;  %s3604_s13 = inlined_call_operand.vmem [shape: bf16[2,32,128], index: 13, kind: input, shape index: {}]   ;;  %s3605_s14 = inlined_call_operand.vmem [shape: f32[2,1,128], index: 14, kind: input, shape index: {}]   ;;  %s3606_s15 = inlined_call_operand.vmem [shape: bf16[2,128,32], index: 15, kind: input, shape index: {}]   ;;  %s3607_s16 = inlined_call_operand.vmem [shape: f32[2,1,32], index: 16, kind: input, shape index: {}]   ;;  %s3608_s17 = inlined_call_operand.vmem [shape: f32[1,10,64], index: 17, kind: output, shape index: {}]  }
   0x1   :  { %3616 = sst [smem:[#allocation7_spill]] %s3591_s0  ;;  %s3130_s26 = smov 0  }
   0x2   :  { %3617 = sst [smem:[#allocation8_spill]] %s3592_s1 }
   0x3   :  { %3618 = sst [smem:[#allocation9_spill]] %s3594_s3 }
   0x4   :  { %3619 = sst [smem:[#allocation10_spill]] %s3595_s4 }
   0x5   :  { %3620 = sst [smem:[#allocation11_spill]] %s3598_s7 }
   0x6   :  { %3621 = sst [smem:[#allocation12_spill]] %s3600_s9 }
   0x7   :  { %3622 = sst [smem:[#allocation13_spill]] %s3608_s17 }
   0x8 LB: > { %3623 = sst [smem:[#allocation3_spill]] %s3011_s25  ;;  %s36_s27 = sadd.s32 1, %s3011_s25  ;;  %s3015_s26 = sphi %s3130_s26, %s27_s26   ;;  %s3011_s25 = sphi %s3128_s25, %s3644_s25   ;;  %s3007_s24 = sphi %s3126_s24, %s3643_s24  }
   0x9   : > { %3624 = sst [smem:[#allocation4_spill]] %s3015_s26  ;;  %p2590_p0 = scmp.ge.s32.totalorder %s3015_s26, 1 }
   0xa   : > { %p37_p1 = scmp.ge.s32.totalorder %s36_s27, 2  ;;  %p603_p2 = scmp.lt.s32.totalorder %s3015_s26, 3 }
   0xc   : > { %s3646_s27 = smov (%p37_p1, %s36_s27), 0  ;;  %p604_p3 = pnand %p2590_p0, %p603_p2 }
   0xd   : > { %3625 = sst [smem:[#allocation5_spill]] %s3646_s27 }
   0xe   : > { %607 = sbr.rel (%p604_p3) target bundleno = 3552 (0xde0), region = 88 }
  0x13   : > { %p704_p4 = scmp.lt.s32.totalorder %s3007_s24, 1  ;;  %s3626_s7 = sld [smem:[#allocation11_spill]] }
  0x14   : > { %s3627_s9 = sld [smem:[#allocation12_spill]]  ;;  %p2599_p5 = scmp.ne.s32.totalorder %s3007_s24, 0 }
  0x15   : > { %s3148_s28 = scalar_select %p704_p4, %s3007_s24, 1 }
  0x16   : > { %s3629_s29 = sld [smem:[#allocation8_spill]] (!%p2599_p5) }
  0x17   : > { %s2665_s20 = sshll.u32 %s3148_s28, 4  ;;  %s728_s3 = scalar_lea.vmem %s3602_s11, %s3148_s28 }
  0x18   : > { %s731_s23 = scalar_lea.vmem %s3603_s12, %s3148_s28  ;;  %s747_s21 = scalar_lea.vmem %s3607_s16, %s3148_s28 }
  0x19   : > { %s3166_s27 = scalar_lea.vmem %s3626_s7, %s2665_s20  ;;  %s3188_s7 = scalar_lea.vmem %s3604_s13, %s2665_s20 }
  0x1a   : > { %s3171_s17 = scalar_lea.vmem %s3627_s9, %s2665_s20  ;;  %s739_s9 = scalar_lea.vmem %s3605_s14, %s3148_s28 }
  0x1b   : > { %3628 = sst [smem:[#allocation6_spill]] %s3171_s17  ;;  %s2668_s17 = sshll.u32 %s3148_s28, 6 }
  0x1c   : > { %s3198_s18 = scalar_lea.vmem %s3606_s15, %s2668_s17  ;;  %757 = sbr.rel (%p2599_p5) target bundleno = 282 (0x11a), region = 92 }
  0x1d   : > { %s3630_s20 = sld [smem:[#allocation7_spill]] (!%p2599_p5) }
  0x21   : > { %v2902_v0 = vld [vmem:[%s3629_s29 + $0x38] sm:$0xff]   ;;  %v3017_v1 = vmov 0   ;;  %v2903_v2 = vld [vmem:[%s3629_s29 + $0x30] sm:$0xff]   ;;  %v2904_v3 = vld [vmem:[%s3629_s29 + $0x28] sm:$0xff]   ;;  %vm867_vm0 = vcmask 523264   ;;  %vm912_vm1 = vcmask 261120  }
  0x22   : > { %871 = vmatprep.subr.bf16.mxu0 %v3017_v1  ;;  %v2905_v4 = vld [vmem:[%s3629_s29 + $0x20] sm:$0xff]   ;;  %v2906_v6 = vld [vmem:[%s3629_s29 + $0x18] sm:$0xff]   ;;  %v2907_v7 = vld [vmem:[%s3629_s29 + $0x10] sm:$0xff]   ;;  %vm914_vm2 = vcmask 254976  }
  0x23   : > { %872 = vmatpush1.bf16.msra.mxu0 %v2902_v0  ;;  %v2916_v5 = vld [vmem:[%s3630_s20 + $0x4] ss:$8 sps:$4 sm:$0x1f]   ;;  %v2910_v10 = vld [vmem:[%s3629_s29 + $0x58] sm:$0xff]   ;;  %v2911_v11 = vld [vmem:[%s3629_s29 + $0x50] sm:$0xff]  }
  0x24   : > { %873 = vmatprep.subr.bf16.mxu0 %v3017_v1  ;;  %2614 = vmatprep.mubr.msk.bf16.mxu0 %vm867_vm0, %v2916_v5  ;;  %v2908_v8 = vld [vmem:[%s3629_s29 + $0x8] sm:$0xff]   ;;  %v2909_v9 = vld [vmem:[%s3629_s29] sm:$0xff]  }
  0x25   : > { %v2912_v12 = vld [vmem:[%s3629_s29 + $0x48] sm:$0xff]   ;;  %v2913_v13 = vld [vmem:[%s3629_s29 + $0x40] sm:$0xff]  }
  0x26   : > { %v2914_v14 = vld [vmem:[%s3630_s20] ss:$8 sps:$4 sm:$0x1f]  }
  0x27   : > { %874 = vmatpush1.bf16.msra.mxu0 %v2903_v2  ;;  %v784_v15 = vld [vmem:[%s3593_s2] sm:$0xff]  ;;  %v785_v19 = vld [vmem:[%s3593_s2 + $0x8] sm:$0x3] }
  0x28   : > { %875 = vmatprep.subr.bf16.mxu0 %v3017_v1 }
  0x2b   : > { %876 = vmatpush1.bf16.msra.mxu0 %v2904_v3 }
  0x2c   : > { %877 = vmatprep.subr.bf16.mxu0 %v3017_v1 }
  0x2f   : > { %878 = vmatpush1.bf16.msra.mxu0 %v2905_v4 }
  0x30   : > { %879 = vmatprep.subr.bf16.mxu0 %v3017_v1 }
  0x33   : > { %880 = vmatpush1.bf16.msra.mxu0 %v2906_v6 }
  0x34   : > { %881 = vmatprep.subr.bf16.mxu0 %v3017_v1 }
  0x37   : > { %882 = vmatpush1.bf16.msra.mxu0 %v2907_v7 }
  0x38   : > { %883 = vmatprep.subr.bf16.mxu0 %v3017_v1 }
  0x3b   : > { %884 = vmatpush1.bf16.msra.mxu0 %v2908_v8 }
  0x3c   : > { %885 = vmatprep.subr.bf16.mxu0 %v3017_v1 }
  0x3f   : > { %886 = vmatpush1.bf16.msra.mxu0 %v2909_v9 }
  0x40   : > { %895 = vmatprep.subr.bf16.mxu0 %v3017_v1 }
  0x43   : > { %896 = vmatpush2.bf16.msra.mxu0 %v2910_v10 }
  0x44   : > { %897 = vmatprep.subr.bf16.mxu0 %v3017_v1 }
  0x47   : > { %898 = vmatpush2.bf16.msra.mxu0 %v2911_v11 }
  0x48   : > { %899 = vmatprep.subr.bf16.mxu0 %v3017_v1 }
  0x4b   : > { %900 = vmatpush2.bf16.msra.mxu0 %v2912_v12 }
  0x4c   : > { %901 = vmatprep.subr.bf16.mxu0 %v3017_v1 }
  0x4f   : > { %902 = vmatpush2.bf16.msra.mxu0 %v2913_v13 }
  0x52   : > { %904 = vmatmul.mubr.bf16.vlgmr.msra.gmra.mxu0 %v2914_v14 }
 0x112   : > { %v905_v16 = vpop.f32.mrf.mxu0 }
 0x113   : > { %v906_v17 = vadd.f32 %v905_v16, %v784_v15 }
 0x114   : > { %v907_v18 = vpop.f32.mrf.mxu0 }
 0x115   : > { %913 = vst.msk [vmem:[#allocation2] sm:$0xff] %vm912_vm1, %v906_v17 }
 0x116   : > { %v908_v20 = vpop.f32.mrf.mxu0 }
 0x117   : > { %v909_v21 = vadd.f32 %v908_v20, %v785_v19 }
 0x118   : > { %v910_v22 = vpop.f32.mrf.mxu0 }
 0x119   : > { %915 = vst.msk [vmem:[#allocation2 + $0x8] sm:$0x3] %vm914_vm2, %v909_v21 }
 0x11a PF: > { %vm920_vm3 = vcmask 261120   ;;  %vm924_vm4 = vcmask 254976   ;;  %v2927_v37 = vld [vmem:[%s3166_s27 + $0x8] sm:$0xff]   ;;  %v3018_v38 = vmov 0.0   ;;  %vm3019_vm5 = vmmov 0   ;;  %v2928_v39 = vld [vmem:[%s3166_s27] sm:$0xff]   ;;  %s3631_s4 = scalar_lea.vmem %s3596_s5, %s3148_s28  ;;  %s3632_s19 = scalar_lea.vmem %s3597_s6, %s3148_s28 }
 0x11b   : > { %2719 = vmatprep.subr.bf16.mxu0 %v3018_v38  ;;  %2723 = vmatprep.mubr.msk.bf16.mxu0 %vm3019_vm5, %v3018_v38  ;;  %v2615_v48 = vld [vmem:[%s3631_s4] ss:$0 sm:$0xff]  ;;  %s3633_s25 = scalar_lea.vmem %s3599_s8, %s3148_s28  ;;  %s3020_s17 = smov 88   ;;  %vm1037_vm6 = vcmask 64512   ;;  %vm1085_vm7 = vcmask 36864   ;;  %vm1104_vm8 = vcmask 1041408  }
 0x11c   : > { %v3255_v23 = vld [vmem:[#allocation2] sm:$0xff]  ;;  %2720 = vmatpush3.bf16.msra.mxu0 %v2927_v37  ;;  %2739 = vmatprep.subr.bf16.mxu1 %v3018_v38  ;;  %s3021_s27 = smov 96   ;;  %s3022_s26 = smov 120   ;;  %vm1105_vm9 = vcmask 1042432   ;;  %vm1100_vm10 = vcmask 39936   ;;  %vm1497_vm11 = vcmask 130048  }
 0x11d   : > { %v921_v25 = vsel %vm920_vm3, %v3255_v23, 0.0  ;;  %2721 = vmatprep.subr.bf16.mxu0 %v3018_v38  ;;  %2741 = vmatprep.mubr.msk.bf16.mxu1 %vm3019_vm5, %v3018_v38  ;;  %v2616_v52 = vld [vmem:[%s3632_s19] ss:$0 sm:$0xff]  ;;  %s3023_s4 = smov 112   ;;  %s3024_s30 = smov 80   ;;  %vm1499_vm12 = vcmask 195584  }
 0x11e   : > { %922 = vadd.xlane.f32.xlu0 %v921_v25  ;;  %v2617_v57 = vld [vmem:[%s3633_s25] ss:$0 sm:$0xff]  ;;  %s3025_s1 = smov 104   ;;  %s3026_s19 = smov 72   ;;  %vm1970_vm13 = vcmask 1044480  }
 0x11f   : > { %s3027_s22 = smov 56   ;;  %s3028_s0 = smov 64  }
 0x120   : > { %v3257_v24 = vld [vmem:[#allocation2 + $0x8] sm:$0x3]  ;;  %2722 = vmatpush3.bf16.msra.mxu0 %v2928_v39  ;;  %s3029_s25 = smov 48  }
 0x121   : > { %v925_v26 = vsel %vm924_vm4, %v3257_v24, 0.0  ;;  %2727 = vmatprep.subr.bf16.mxu0 %v3018_v38 }
 0x122   : > { %926 = vadd.xlane.f32.xlu0 %v925_v26 }
 0x1a7   : > { %v923_v27 = vpop.xlane.xlu0 %922 }
 0x1a8   : > { %v929_v28 = vmul.f32 0.03125, %v923_v27 }
 0x1aa   : > { %v931_v29 = vsub.f32 %v3255_v23, %v929_v28 }
 0x1ab   : > { %v927_v30 = vpop.xlane.xlu0 %926 }
 0x1ac   : > { %v930_v31 = vmul.f32 0.03125, %v927_v30  ;;  %v933_v32 = vmul.f32 %v931_v29, %v931_v29 }
 0x1ae   : > { %v932_v33 = vsub.f32 %v3257_v24, %v930_v31  ;;  %v935_v34 = vsel %vm920_vm3, %v933_v32, 0.0 }
 0x1af   : > { %936 = vadd.xlane.f32.xlu1 %v935_v34 }
 0x1b0   : > { %v934_v35 = vmul.f32 %v932_v33, %v932_v33 }
 0x1b2   : > { %v938_v36 = vsel %vm924_vm4, %v934_v35, 0.0 }
 0x1b3   : > { %939 = vadd.xlane.f32.xlu1 %v938_v36 }
 0x238   : > { %v937_v40 = vpop.xlane.xlu1 %936 }
 0x239   : > { %v941_v41 = vmul.f32 0.03125, %v937_v40 }
 0x23b   : > { %v943_v42 = vadd.f32 1e-06, %v941_v41 }
 0x23c   : > { %v940_v43 = vpop.xlane.xlu1 %939 }
 0x23d   : > { %2941 = vrsqrt.f32 %v943_v42  ;;  %v942_v44 = vmul.f32 0.03125, %v940_v43 }
 0x23f   : > { %v944_v45 = vadd.f32 1e-06, %v942_v44 }
 0x241   : > { %2943 = vrsqrt.f32 %v944_v45 }
 0x24a   : > { %v2942_v46 = vpop.eup %2941 }
 0x24b   : > { %v947_v47 = vmul.f32 %v2942_v46, %v931_v29 }
 0x24d   : > { %v955_v51 = vmul.f32 %v2615_v48, %v947_v47 }
 0x24e   : > { %v2944_v49 = vpop.eup %2943 }
 0x24f   : > { %v948_v50 = vmul.f32 %v2944_v49, %v932_v33  ;;  %v963_v54 = vadd.f32 %v2616_v52, %v955_v51 }
 0x251   : > { %v956_v53 = vmul.f32 %v2615_v48, %v948_v50 }
 0x253   : > { %v964_v55 = vadd.f32 %v2616_v52, %v956_v53 }
 0x255   : > { %v969_v56 = vpack.c.bf16 %v964_v55, %v963_v54 }
 0x257   : > { %2724 = vmatmul.mubr.msk.bf16.vlgmr.msra.gmra.mxu0 %vm920_vm3, %v969_v56 }
 0x258   : > { %2729 = vmatprep.mubr.msk.bf16.mxu0 %vm3019_vm5, %v3018_v38 }
 0x317   : > { %v1026_v58 = vpop.f32.mrf.mxu0 }
 0x318   : > { %v1027_v59 = vadd.f32 %v2617_v57, %v1026_v58 }
 0x319   : > { %v2725_v60 = vpop.f32.mrf.mxu0 }
 0x31a   : > { %v3295_v61 = vpack.c.bf16 %v1027_v59, %v1027_v59 }
 0x31b   : > { %v1029_v62 = vpop.f32.mrf.mxu0 }
 0x31c   : > { %v1030_v63 = vadd.f32 %v2617_v57, %v1029_v62  ;;  %1153 = vrot.lane.b32.xlu1 %v3295_v61, %s3020_s17  ;;  %1035 = vrot.lane.b32.xlu0 %v3295_v61, %s3021_s27 }
 0x31d   : > { %v2726_v0 = vpop.f32.mrf.mxu0 }
 0x31e   : > { %v1501_v1 = vpack.c.bf16 %v1030_v63, %v1027_v59 }
 0x320   : > { %v1503_v2 = vshrl.u32 %v1501_v1, 16  ;;  %v1506_v3 = vshll.u32 %v1501_v1, 16  ;;  %1151 = vrot.lane.b32.xlu1 %v3295_v61, %s3022_s26  ;;  %1262 = vrot.lane.b32.xlu0 %v3295_v61, %s3023_s4 }
 0x322   : > { %v1505_v4 = vrot.slane %v1503_v2, 2  ;;  %v1508_v5 = vrot.slane %v1506_v3, 3 }
 0x324   : > { %1264 = vrot.lane.b32.xlu1 %v3295_v61, %s3024_s30  ;;  %1373 = vrot.lane.b32.xlu0 %v3295_v61, %s3025_s1  ;;  %v3303_v6 = vor.u32 %v1508_v5, %v1505_v4 }
 0x328   : > { %1375 = vrot.lane.b32.xlu1 %v3295_v61, %s3026_s19  ;;  %1621 = vrot.lane.b32.xlu0 %v3303_v6, %s3020_s17  ;;  %s3031_s17 = smov 40  }
 0x32c   : > { %1732 = vrot.lane.b32.xlu0 %v3303_v6, %s3024_s30  ;;  %1510 = vrot.lane.b32.xlu1 %v3303_v6, %s3021_s27  ;;  %s3634_s27 = sld [smem:[#allocation6_spill]]  ;;  %s3034_s30 = smov 24  }
 0x330   : > { %1843 = vrot.lane.b32.xlu0 %v3303_v6, %s3026_s19  ;;  %1619 = vrot.lane.b32.xlu1 %v3303_v6, %s3022_s26  ;;  %s3032_s26 = smov 8  }
 0x334   : > { %1730 = vrot.lane.b32.xlu1 %v3303_v6, %s3023_s4  ;;  %s3033_s4 = smov 16  }
 0x338   : > { %1841 = vrot.lane.b32.xlu1 %v3303_v6, %s3025_s1 }
 0x33c   : > { %1214 = vrot.lane.b32.xlu1 %v3295_v61, %s3027_s22 }
 0x38e   : > { %v1154_v7 = vpop.permute.xlu1 %1153  ;;  %v1036_v8 = vpop.permute.xlu0 %1035 }
 0x38f   : > { %v1042_v9 = vsel %vm1037_vm6, %v1036_v8, 0  ;;  %v1159_v10 = vsel %vm1037_vm6, %v1154_v7, 0 }
 0x390   : > { %2728 = vmatpush3.bf16.xpose.msra.mxu0 %v1042_v9  ;;  %2740 = vmatpush3.bf16.xpose.msra.mxu1 %v1159_v10 }
 0x391   : > { %2751 = vmatprep.subr.bf16.mxu1 %v3018_v38  ;;  %2733 = vmatprep.subr.bf16.mxu0 %v3018_v38 }
 0x392   : > { %v1152_v11 = vpop.permute.xlu1 %1151  ;;  %v1263_v15 = vpop.permute.xlu0 %1262 }
 0x396   : > { %v1265_v12 = vpop.permute.xlu1 %1264  ;;  %v1374_v18 = vpop.permute.xlu0 %1373 }
 0x397   : > { %v1270_v13 = vsel %vm1037_vm6, %v1265_v12, 0  ;;  %2730 = vmatmul.mubr.msk.bf16.vlgmr.msra.gmra.mxu0 %vm1037_vm6, %v3295_v61  ;;  %2742 = vmatmul.mubr.msk.bf16.vlgmr.msra.gmra.mxu1 %vm1037_vm6, %v1152_v11 }
 0x398   : > { %2752 = vmatpush3.bf16.xpose.msra.mxu1 %v1270_v13  ;;  %2753 = vmatprep.mubr.msk.bf16.mxu1 %vm3019_vm5, %v3018_v38 }
 0x399   : > { %2763 = vmatprep.subr.bf16.mxu1 %v3018_v38  ;;  %2735 = vmatprep.mubr.msk.bf16.mxu0 %vm3019_vm5, %v3018_v38 }
 0x39a   : > { %v1376_v14 = vpop.permute.xlu1 %1375  ;;  %v1622_v20 = vpop.permute.xlu0 %1621 }
 0x39b   : > { %v1381_v16 = vsel %vm1037_vm6, %v1376_v14, 0  ;;  %v1627_v21 = vsel %vm1037_vm6, %v1622_v20, 0 }
 0x39e   : > { %v1511_v17 = vpop.permute.xlu1 %1510  ;;  %v1733_v22 = vpop.permute.xlu0 %1732 }
 0x39f   : > { %2754 = vmatmul.mubr.msk.bf16.vlgmr.msra.gmra.mxu1 %vm1037_vm6, %v1263_v15  ;;  %v1516_v19 = vsel %vm1037_vm6, %v1511_v17, 0  ;;  %v1738_v26 = vsel %vm1037_vm6, %v1733_v22, 0 }
 0x3a0   : > { %2764 = vmatpush3.bf16.xpose.msra.mxu1 %v1381_v16  ;;  %2765 = vmatprep.mubr.msk.bf16.mxu1 %vm3019_vm5, %v3018_v38 }
 0x3a1   : > { %2775 = vmatprep.subr.bf16.mxu1 %v3018_v38 }
 0x3a2   : > { %v1620_v25 = vpop.permute.xlu1 %1619  ;;  %v1844_v27 = vpop.permute.xlu0 %1843 }
 0x3a3   : > { %v1849_v29 = vsel %vm1037_vm6, %v1844_v27, 0 }
 0x3a6   : > { %v1731_v28 = vpop.permute.xlu1 %1730 }
 0x3a7   : > { %2766 = vmatmul.mubr.msk.bf16.vlgmr.msra.gmra.mxu1 %vm1037_vm6, %v1374_v18 }
 0x3a8   : > { %2776 = vmatpush3.bf16.xpose.msra.mxu1 %v1516_v19  ;;  %2777 = vmatprep.mubr.msk.bf16.mxu1 %vm3019_vm5, %v3018_v38 }
 0x3a9   : > { %2787 = vmatprep.subr.bf16.mxu1 %v3018_v38 }
 0x3aa   : > { %v1842_v30 = vpop.permute.xlu1 %1841 }
 0x3ae   : > { %v3384_v18 = vpop.permute.xlu1 %1214 }
 0x3af   : > { %2778 = vmatmul.mubr.msk.bf16.vlgmr.msra.gmra.mxu1 %vm1037_vm6, %v3303_v6 }
 0x3b0   : > { %2788 = vmatpush3.bf16.xpose.msra.mxu1 %v1627_v21  ;;  %2789 = vmatprep.mubr.msk.bf16.mxu1 %vm3019_vm5, %v3018_v38  ;;  %v3030_v21 = vmov 65535  }
 0x3b1   : > { %2799 = vmatprep.subr.bf16.mxu1 %v3018_v38  ;;  %v1106_v22 = vsel %vm1104_vm8, 4294967295, %v3030_v21 }
 0x3b7   : > { %2790 = vmatmul.mubr.msk.bf16.vlgmr.msra.gmra.mxu1 %vm1037_vm6, %v1620_v25 }
 0x3b8   : > { %2800 = vmatpush3.bf16.xpose.msra.mxu1 %v1738_v26  ;;  %2801 = vmatprep.mubr.msk.bf16.mxu1 %vm3019_vm5, %v3018_v38 }
 0x3b9   : > { %2811 = vmatprep.subr.bf16.mxu1 %v3018_v38 }
 0x3bf   : > { %2802 = vmatmul.mubr.msk.bf16.vlgmr.msra.gmra.mxu1 %vm1037_vm6, %v1731_v28 }
 0x3c0   : > { %2812 = vmatpush3.bf16.xpose.msra.mxu1 %v1849_v29  ;;  %2813 = vmatprep.mubr.msk.bf16.mxu1 %vm3019_vm5, %v3018_v38  ;;  %v3388_v29 = vsel %vm1105_vm9, %v1106_v22, 0 }
 0x3c1   : > { %2823 = vmatprep.subr.bf16.mxu1 %v3018_v38 }
 0x3c7   : > { %2814 = vmatmul.mubr.msk.bf16.vlgmr.msra.gmra.mxu1 %vm1037_vm6, %v1842_v30 }
 0x3c8   : > { %2827 = vmatprep.mubr.msk.bf16.mxu1 %vm3019_vm5, %v3018_v38 }
 0x457   : > { %v1078_v31 = vpop.f32.mrf.mxu0  ;;  %v1195_v32 = vpop.f32.mrf.mxu1 }
 0x458   : > { %v3357_v33 = vmul.f32 0.35355338, %v1078_v31  ;;  %v3359_v34 = vmul.f32 0.35355338, %v1195_v32 }
 0x459   : > { %v2731_v35 = vpop.f32.mrf.mxu0  ;;  %v2743_v36 = vpop.f32.mrf.mxu1 }
 0x45a   : > { %v1202_v37 = vsel %vm1085_vm7, %v3359_v34, -inf  ;;  %v1086_v39 = vsel %vm1085_vm7, %v3357_v33, -inf }
 0x45b   : > { %v1198_v40 = vpop.f32.mrf.mxu1  ;;  %1203 = vmax.xlane.f32.xlu1 %v1202_v37  ;;  %1087 = vmax.xlane.f32.xlu0 %v1086_v39  ;;  %v1081_v41 = vpop.f32.mrf.mxu0 }
 0x45d   : > { %v2732_v42 = vpop.f32.mrf.mxu0  ;;  %v2744_v43 = vpop.f32.mrf.mxu1 }
 0x45f   : > { %v1306_v44 = vpop.f32.mrf.mxu1 }
 0x460   : > { %v1312_v8 = vmul.f32 0.35355338, %v1306_v44 }
 0x461   : > { %v2755_v45 = vpop.f32.mrf.mxu1 }
 0x462   : > { %v1313_v12 = vsel %vm1085_vm7, %v1312_v8, -inf }
 0x463   : > { %v1309_v46 = vpop.f32.mrf.mxu1 }
 0x465   : > { %v2756_v47 = vpop.f32.mrf.mxu1 }
 0x467   : > { %v1417_v48 = vpop.f32.mrf.mxu1 }
 0x468   : > { %v1423_v11 = vmul.f32 0.35355338, %v1417_v48 }
 0x469   : > { %v2767_v49 = vpop.f32.mrf.mxu1 }
 0x46a   : > { %v1424_v14 = vsel %vm1085_vm7, %v1423_v11, -inf }
 0x46b   : > { %v1420_v50 = vpop.f32.mrf.mxu1 }
 0x46d   : > { %v2768_v51 = vpop.f32.mrf.mxu1 }
 0x46f   : > { %v1552_v52 = vpop.f32.mrf.mxu1 }
 0x470   : > { %v1558_v13 = vmul.f32 0.35355338, %v1552_v52 }
 0x471   : > { %v2779_v53 = vpop.f32.mrf.mxu1  ;;  %1098 = vrot.lane.b32.xlu0 %v3295_v61, %s3028_s0 }
 0x472   : > { %v1559_v16 = vsel %vm1085_vm7, %v1558_v13, -inf }
 0x473   : > { %v1555_v54 = vpop.f32.mrf.mxu1 }
 0x475   : > { %v2780_v55 = vpop.f32.mrf.mxu1 }
 0x477   : > { %v1663_v56 = vpop.f32.mrf.mxu1 }
 0x478   : > { %v3367_v57 = vmul.f32 0.35355338, %v1663_v56 }
 0x479   : > { %v2791_v58 = vpop.f32.mrf.mxu1 }
 0x47a   : > { %v1670_v59 = vsel %vm1085_vm7, %v3367_v57, -inf }
 0x47b   : > { %1671 = vmax.xlane.f32.xlu1 %v1670_v59  ;;  %v1666_v60 = vpop.f32.mrf.mxu1 }
 0x47d   : > { %v2792_v62 = vpop.f32.mrf.mxu1 }
 0x47f   : > { %v1774_v63 = vpop.f32.mrf.mxu1 }
 0x480   : > { %v3377_v15 = vmul.f32 0.35355338, %v1774_v63 }
 0x481   : > { %v2803_v0 = vpop.f32.mrf.mxu1 }
 0x482   : > { %v1781_v17 = vsel %vm1085_vm7, %v3377_v15, -inf }
 0x483   : > { %v1777_v1 = vpop.f32.mrf.mxu1 }
 0x485   : > { %v2804_v2 = vpop.f32.mrf.mxu1 }
 0x487   : > { %v1885_v3 = vpop.f32.mrf.mxu1 }
 0x488   : > { %v3371_v4 = vmul.f32 0.35355338, %v1885_v3 }
 0x489   : > { %v2815_v5 = vpop.f32.mrf.mxu1 }
 0x48a   : > { %v1892_v7 = vsel %vm1085_vm7, %v3371_v4, -inf }
 0x48b   : > { %1893 = vmax.xlane.f32.xlu1 %v1892_v7  ;;  %v1888_v9 = vpop.f32.mrf.mxu1 }
 0x48d   : > { %v2816_v10 = vpop.f32.mrf.mxu1 }
 0x490   : > { %1314 = vmax.xlane.f32.xlu0 %v1313_v12 }
 0x494   : > { %1425 = vmax.xlane.f32.xlu0 %v1424_v14 }
 0x498   : > { %1560 = vmax.xlane.f32.xlu0 %v1559_v16 }
 0x49c   : > { %1782 = vmax.xlane.f32.xlu0 %v1781_v17 }
 0x4b2   : > { %1325 = vrot.lane.b32.xlu0 %v3295_v61, %s3029_s25 }
 0x4e4   : > { %v1204_v19 = vpop.xlane.xlu1 %1203  ;;  %v1088_v20 = vpop.xlane.xlu0 %1087 }
 0x4e5   : > { %v1205_v25 = vsub.f32 %v3359_v34, %v1204_v19  ;;  %v1089_v26 = vsub.f32 %v3357_v33, %v1088_v20 }
 0x4e7   : > { %v1206_v27 = vmul.f32 1.442695, %v1205_v25  ;;  %v1090_v28 = vmul.f32 1.442695, %v1089_v26 }
 0x4e8   : > { %v1099_v30 = vpop.permute.xlu0 %1098 }
 0x4e9   : > { %2945 = vpow2.f32 %v1206_v27  ;;  %v1109_v31 = vand.u32 %v3388_v29, %v1099_v30 }
 0x4ea   : > { %2947 = vpow2.f32 %v1090_v28 }
 0x4eb   : > { %2734 = vmatpush3.bf16.msra.mxu0 %v1109_v31 }
 0x4ec   : > { %2745 = vmatprep.subr.bf16.mxu0 %v3018_v38 }
 0x4f6   : > { %v3392_v32 = vpop.eup %2945 }
 0x4f7   : > { %v2948_v35 = vpop.eup %2947  ;;  %v1208_v34 = vsel %vm1085_vm7, %v3392_v32, 0.0 }
 0x4f8   : > { %1209 = vadd.xlane.f32.xlu1 %v1208_v34  ;;  %v1092_v33 = vsel %vm1085_vm7, %v2948_v35, 0.0 }
 0x4f9   : > { %1093 = vadd.xlane.f32.xlu0 %v1092_v33 }
 0x504   : > { %v1672_v40 = vpop.xlane.xlu1 %1671 }
 0x505   : > { %v1673_v43 = vsub.f32 %v3367_v57, %v1672_v40 }
 0x507   : > { %v1674_v47 = vmul.f32 1.442695, %v1673_v43 }
 0x509   : > { %1571 = vrot.lane.b32.xlu1 %v3303_v6, %s3028_s0 }
 0x514   : > { %v1894_v60 = vpop.xlane.xlu1 %1893 }
 0x515   : > { %v1895_v62 = vsub.f32 %v3371_v4, %v1894_v60 }
 0x517   : > { %v1896_v63 = vmul.f32 1.442695, %v1895_v62 }
 0x519   : > { %v1315_v36 = vpop.xlane.xlu0 %1314 }
 0x51a   : > { %v1316_v37 = vsub.f32 %v1312_v8, %v1315_v36 }
 0x51c   : > { %v1317_v39 = vmul.f32 1.442695, %v1316_v37 }
 0x51d   : > { %v1426_v41 = vpop.xlane.xlu0 %1425 }
 0x51e   : > { %2949 = vpow2.f32 %v1317_v39  ;;  %v1427_v42 = vsub.f32 %v1423_v11, %v1426_v41  ;;  %v1220_v11 = vand.u32 %v3384_v18, %v3388_v29 }
 0x520   : > { %v1428_v44 = vmul.f32 1.442695, %v1427_v42 }
 0x521   : > { %v1561_v45 = vpop.xlane.xlu0 %1560 }
 0x522   : > { %2951 = vpow2.f32 %v1428_v44  ;;  %v1562_v46 = vsub.f32 %v1558_v13, %v1561_v45 }
 0x524   : > { %v1563_v48 = vmul.f32 1.442695, %v1562_v46 }
 0x525   : > { %v1783_v57 = vpop.xlane.xlu0 %1782 }
 0x526   : > { %2953 = vpow2.f32 %v1563_v48  ;;  %v1784_v58 = vsub.f32 %v3377_v15, %v1783_v57 }
 0x527   : > { %2955 = vpow2.f32 %v1674_v47 }
 0x528   : > { %v1785_v59 = vmul.f32 1.442695, %v1784_v58 }
 0x529   : > { %v1326_v3 = vpop.permute.xlu0 %1325 }
 0x52a   : > { %2957 = vpow2.f32 %v1785_v59  ;;  %v1331_v13 = vand.u32 %v1326_v3, %v3388_v29 }
 0x52b   : > { %v2950_v49 = vpop.eup %2949  ;;  %2959 = vpow2.f32 %v1896_v63 }
 0x52c   : > { %v1319_v50 = vsel %vm1085_vm7, %v2950_v49, 0.0 }
 0x52d   : > { %1320 = vadd.xlane.f32.xlu0 %v1319_v50 }
 0x52f   : > { %v3401_v51 = vpop.eup %2951 }
 0x530   : > { %v1430_v52 = vsel %vm1085_vm7, %v3401_v51, 0.0 }
 0x531   : > { %1431 = vadd.xlane.f32.xlu1 %v1430_v52 }
 0x533   : > { %v3405_v53 = vpop.eup %2953 }
 0x534   : > { %v1565_v54 = vsel %vm1085_vm7, %v3405_v53, 0.0  ;;  %v3409_v55 = vpop.eup %2955 }
 0x535   : > { %1566 = vadd.xlane.f32.xlu1 %v1565_v54  ;;  %v1676_v56 = vsel %vm1085_vm7, %v3409_v55, 0.0 }
 0x537   : > { %v3418_v0 = vpop.eup %2957 }
 0x538   : > { %v1787_v1 = vsel %vm1085_vm7, %v3418_v0, 0.0 }
 0x539   : > { %1677 = vadd.xlane.f32.xlu1 %v1676_v56 }
 0x543   : > { %1436 = vrot.lane.b32.xlu0 %v3295_v61, %s3031_s17  ;;  %v3422_v61 = vpop.eup %2959 }
 0x544   : > { %v1898_v2 = vsel %vm1085_vm7, %v3422_v61, 0.0 }
 0x54a   : > { %1682 = vrot.lane.b32.xlu1 %v3303_v6, %s3027_s22  ;;  %s3635_s22 = scalar_lea.vmem %s3601_s10, %s3148_s28 }
 0x562   : > { %1788 = vadd.xlane.f32.xlu0 %v1787_v1 }
 0x56e   : > { %1899 = vadd.xlane.f32.xlu1 %v1898_v2 }
 0x578   : > { %1793 = vrot.lane.b32.xlu0 %v3303_v6, %s3029_s25 }
 0x57f   : > { %1904 = vrot.lane.b32.xlu1 %v3303_v6, %s3031_s17 }
 0x581   : > { %v1210_v5 = vpop.xlane.xlu1 %1209 }
 0x582   : > { %v1094_v4 = vpop.xlane.xlu0 %1093 }
 0x583   : > { %2961 = vrcp.f32 %v1094_v4 }
 0x584   : > { %2963 = vrcp.f32 %v1210_v5 }
 0x585   : > { %v1572_v14 = vpop.permute.xlu1 %1571 }
 0x586   : > { %v1577_v31 = vand.u32 %v1572_v14, %v3388_v29 }
 0x590   : > { %v2962_v7 = vpop.eup %2961 }
 0x591   : > { %v1096_v8 = vmul.f32 %v2962_v7, %v2948_v35  ;;  %v2964_v10 = vpop.eup %2963 }
 0x592   : > { %v1212_v6 = vmul.f32 %v2964_v10, %v3392_v32 }
 0x593   : > { %v1097_v9 = vpack.c.bf16 %v1096_v8, %v1096_v8 }
 0x594   : > { %v1213_v12 = vpack.c.bf16 %v1212_v6, %v1212_v6 }
 0x595   : > { %2736 = vmatmul.mubr.msk.bf16.vlgmr.msra.gmra.mxu0 %vm1100_vm10, %v1097_v9 }
 0x596   : > { %2746 = vmatpush3.bf16.msra.mxu0 %v1220_v11  ;;  %2747 = vmatprep.mubr.msk.bf16.mxu0 %vm3019_vm5, %v3018_v38 }
 0x597   : > { %2757 = vmatprep.subr.bf16.mxu0 %v3018_v38 }
 0x59d   : > { %2748 = vmatmul.mubr.msk.bf16.vlgmr.msra.gmra.mxu0 %vm1100_vm10, %v1213_v12  ;;  %v2929_v12 = vld [vmem:[%s3634_s27 + $0x8] sm:$0xff]  }
 0x59e   : > { %2758 = vmatpush3.bf16.msra.mxu0 %v1331_v13  ;;  %2759 = vmatprep.mubr.msk.bf16.mxu0 %vm3019_vm5, %v3018_v38 }
 0x59f   : > { %2769 = vmatprep.subr.bf16.mxu0 %v3018_v38  ;;  %2824 = vmatpush3.bf16.msra.mxu1 %v2929_v12  ;;  %v2642_v12 = vld [vmem:[%s731_s23] ss:$0 sm:$0xff] }
 0x5a0   : > { %2825 = vmatprep.subr.bf16.mxu1 %v3018_v38 }
 0x5b6   : > { %v1321_v15 = vpop.xlane.xlu0 %1320 }
 0x5b7   : > { %2965 = vrcp.f32 %v1321_v15 }
 0x5ba   : > { %v1432_v16 = vpop.xlane.xlu1 %1431  ;;  %v1437_v19 = vpop.permute.xlu0 %1436 }
 0x5bb   : > { %2967 = vrcp.f32 %v1432_v16  ;;  %v1442_v25 = vand.u32 %v1437_v19, %v3388_v29  ;;  %v2930_v16 = vld [vmem:[%s3634_s27] sm:$0xff]   ;;  %s3636_s27 = sld [smem:[#allocation9_spill]] (!%p2599_p5) }
 0x5bc   : > { %2826 = vmatpush3.bf16.msra.mxu1 %v2930_v16 }
 0x5bd   : > { %2839 = vmatprep.subr.bf16.mxu1 %v3018_v38 }
 0x5be   : > { %v1567_v17 = vpop.xlane.xlu1 %1566 }
 0x5bf   : > { %2969 = vrcp.f32 %v1567_v17 }
 0x5c2   : > { %v1678_v26 = vpop.xlane.xlu1 %1677 }
 0x5c3   : > { %2971 = vrcp.f32 %v1678_v26 }
 0x5c4   : > { %v2966_v18 = vpop.eup %2965 }
 0x5c5   : > { %v1323_v20 = vmul.f32 %v2966_v18, %v2950_v49 }
 0x5c6   : > { %v1683_v35 = vpop.permute.xlu1 %1682 }
 0x5c7   : > { %v1324_v21 = vpack.c.bf16 %v1323_v20, %v1323_v20  ;;  %v1688_v36 = vand.u32 %v1683_v35, %v3388_v29 }
 0x5c8   : > { %v2968_v22 = vpop.eup %2967 }
 0x5c9   : > { %2760 = vmatmul.mubr.msk.bf16.vlgmr.msra.gmra.mxu0 %vm1100_vm10, %v1324_v21  ;;  %v1434_v27 = vmul.f32 %v2968_v22, %v3401_v51 }
 0x5ca   : > { %2770 = vmatpush3.bf16.msra.mxu0 %v1442_v25  ;;  %2771 = vmatprep.mubr.msk.bf16.mxu0 %vm3019_vm5, %v3018_v38 }
 0x5cb   : > { %2781 = vmatprep.subr.bf16.mxu0 %v3018_v38  ;;  %v1435_v28 = vpack.c.bf16 %v1434_v27, %v1434_v27 }
 0x5cc   : > { %v2970_v30 = vpop.eup %2969 }
 0x5cd   : > { %v1569_v32 = vmul.f32 %v2970_v30, %v3405_v53 }
 0x5cf   : > { %v1570_v34 = vpack.c.bf16 %v1569_v32, %v1569_v32 }
 0x5d0   : > { %v2972_v33 = vpop.eup %2971 }
 0x5d1   : > { %2772 = vmatmul.mubr.msk.bf16.vlgmr.msra.gmra.mxu0 %vm1100_vm10, %v1435_v28  ;;  %v1680_v37 = vmul.f32 %v2972_v33, %v3409_v55 }
 0x5d2   : > { %2782 = vmatpush3.bf16.msra.mxu0 %v1577_v31  ;;  %2783 = vmatprep.mubr.msk.bf16.mxu0 %vm3019_vm5, %v3018_v38 }
 0x5d3   : > { %2793 = vmatprep.subr.bf16.mxu0 %v3018_v38  ;;  %v1681_v39 = vpack.c.bf16 %v1680_v37, %v1680_v37 }
 0x5d9   : > { %2784 = vmatmul.mubr.msk.bf16.vlgmr.msra.gmra.mxu0 %vm1100_vm10, %v1570_v34 }
 0x5da   : > { %2794 = vmatpush3.bf16.msra.mxu0 %v1688_v36  ;;  %2795 = vmatprep.mubr.msk.bf16.mxu0 %vm3019_vm5, %v3018_v38 }
 0x5db   : > { %2805 = vmatprep.subr.bf16.mxu0 %v3018_v38 }
 0x5e1   : > { %2796 = vmatmul.mubr.msk.bf16.vlgmr.msra.gmra.mxu0 %vm1100_vm10, %v1681_v39 }
 0x5e2   : > { %2807 = vmatprep.mubr.msk.bf16.mxu0 %vm3019_vm5, %v3018_v38 }
 0x5eb   : > { %v1789_v40 = vpop.xlane.xlu0 %1788 }
 0x5ec   : > { %2973 = vrcp.f32 %v1789_v40 }
 0x5ef   : > { %v1794_v41 = vpop.permute.xlu0 %1793 }
 0x5f0   : > { %v1799_v42 = vand.u32 %v1794_v41, %v3388_v29 }
 0x5f2   : > { %2806 = vmatpush3.bf16.msra.mxu0 %v1799_v42 }
 0x5f3   : > { %2817 = vmatprep.subr.bf16.mxu0 %v3018_v38 }
 0x5f7   : > { %v1900_v43 = vpop.xlane.xlu1 %1899 }
 0x5f8   : > { %2975 = vrcp.f32 %v1900_v43 }
 0x5f9   : > { %v2974_v44 = vpop.eup %2973 }
 0x5fa   : > { %v1791_v45 = vmul.f32 %v2974_v44, %v3418_v0 }
 0x5fb   : > { %v1905_v46 = vpop.permute.xlu1 %1904 }
 0x5fc   : > { %v1910_v47 = vand.u32 %v1905_v46, %v3388_v29  ;;  %v1792_v48 = vpack.c.bf16 %v1791_v45, %v1791_v45  ;;  %v2640_v45 = vld [vmem:[%s3635_s22] ss:$0 sm:$0xff]  ;;  %s3638_s22 = sld [smem:[#allocation13_spill]] (!%p2599_p5) }
 0x5fe   : > { %2808 = vmatmul.mubr.msk.bf16.vlgmr.msra.gmra.mxu0 %vm1100_vm10, %v1792_v48 }
 0x5ff   : > { %2818 = vmatpush3.bf16.msra.mxu0 %v1910_v47  ;;  %2819 = vmatprep.mubr.msk.bf16.mxu0 %vm3019_vm5, %v3018_v38 }
 0x600   : > { %2831 = vmatprep.subr.bf16.mxu0 %v3018_v38 }
 0x605   : > { %v2976_v49 = vpop.eup %2975 }
 0x606   : > { %v1902_v50 = vmul.f32 %v2976_v49, %v3422_v61 }
 0x608   : > { %v1903_v51 = vpack.c.bf16 %v1902_v50, %v1902_v50 }
 0x60a   : > { %2820 = vmatmul.mubr.msk.bf16.vlgmr.msra.gmra.mxu0 %vm1100_vm10, %v1903_v51 }
 0x60b   : > { %2835 = vmatprep.mubr.msk.bf16.mxu0 %vm3019_vm5, %v3018_v38 }
 0x655   : > { %v1145_v52 = vpop.f32.mrf.mxu0 }
 0x657   : > { %v2737_v29 = vpop.f32.mrf.mxu0 }
 0x659   : > { %v1148_v53 = vpop.f32.mrf.mxu0 }
 0x65b   : > { %v2738_v54 = vpop.f32.mrf.mxu0 }
 0x65d   : > { %v1256_v55 = vpop.f32.mrf.mxu0 }
 0x65f   : > { %v2749_v56 = vpop.f32.mrf.mxu0 }
 0x661   : > { %v1259_v57 = vpop.f32.mrf.mxu0 }
 0x663   : > { %v2750_v58 = vpop.f32.mrf.mxu0 }
 0x689   : > { %v1367_v59 = vpop.f32.mrf.mxu0 }
 0x68b   : > { %v2761_v60 = vpop.f32.mrf.mxu0 }
 0x68d   : > { %v1370_v62 = vpop.f32.mrf.mxu0 }
 0x68f   : > { %v2762_v63 = vpop.f32.mrf.mxu0 }
 0x690   : > { %v2931_v63 = vld [vmem:[%s3188_s7 + $0x8] sm:$0xff]  }
 0x691   : > { %v1478_v0 = vpop.f32.mrf.mxu0  ;;  %2832 = vmatpush3.bf16.msra.mxu0 %v2931_v63 }
 0x692   : > { %2833 = vmatprep.subr.bf16.mxu0 %v3018_v38 }
 0x693   : > { %v2773_v1 = vpop.f32.mrf.mxu0 }
 0x695   : > { %v1481_v61 = vpop.f32.mrf.mxu0 }
 0x697   : > { %v2774_v2 = vpop.f32.mrf.mxu0 }
 0x699   : > { %v1613_v3 = vpop.f32.mrf.mxu0 }
 0x69b   : > { %v2785_v4 = vpop.f32.mrf.mxu0 }
 0x69d   : > { %v1616_v5 = vpop.f32.mrf.mxu0 }
 0x69f   : > { %v2786_v7 = vpop.f32.mrf.mxu0 }
 0x6a1   : > { %v1724_v8 = vpop.f32.mrf.mxu0 }
 0x6a2   : > { %v2917_v9 = vpack.i.bf16 %v1256_v55, %v1724_v8 }
 0x6a3   : > { %v2797_v10 = vpop.f32.mrf.mxu0 }
 0x6a4   : > { %2918 = vrot.lane.b32.xlu0 %v2917_v9, %s3032_s26  ;;  %v2641_v9 = vld [vmem:[%s728_s3] ss:$0 sm:$0xff] }
 0x6a5   : > { %v1727_v11 = vpop.f32.mrf.mxu0 }
 0x6a7   : > { %v2798_v6 = vpop.f32.mrf.mxu0 }
 0x6be   : > { %v1835_v13 = vpop.f32.mrf.mxu0 }
 0x6bf   : > { %v2922_v14 = vpack.i.bf16 %v1367_v59, %v1835_v13 }
 0x6c0   : > { %v2809_v15 = vpop.f32.mrf.mxu0 }
 0x6c1   : > { %2923 = vrot.lane.b32.xlu1 %v2922_v14, %s3033_s4 }
 0x6c2   : > { %v1838_v17 = vpop.f32.mrf.mxu0 }
 0x6c3   : > { %v2933_v17 = vld [vmem:[%s3198_s18 + $0x38] sm:$0xff]  }
 0x6c4   : > { %v2810_v18 = vpop.f32.mrf.mxu0 }
 0x6c5   : > { %1493 = vrot.lane.b32.xlu1 %v1478_v0, %s3034_s30  ;;  %v2932_v0 = vld [vmem:[%s3188_s7] sm:$0xff]   ;;  %v2934_v18 = vld [vmem:[%s3198_s18 + $0x30] sm:$0xff]  }
 0x6c6   : > { %2834 = vmatpush3.bf16.msra.mxu0 %v2932_v0 }
 0x6ca   : > { %v1946_v19 = vpop.f32.mrf.mxu0 }
 0x6cb   : > { %1961 = vrot.lane.b32.xlu0 %v1946_v19, %s3034_s30  ;;  %v2935_v19 = vld [vmem:[%s3198_s18 + $0x28] sm:$0xff]   ;;  %s3637_s30 = sld [smem:[#allocation10_spill]] (!%p2599_p5) }
 0x6cc   : > { %v2821_v20 = vpop.f32.mrf.mxu0 }
 0x6cd   : > { %v2936_v20 = vld [vmem:[%s3198_s18 + $0x20] sm:$0xff]  }
 0x6ce   : > { %v1949_v21 = vpop.f32.mrf.mxu0 }
 0x6cf   : > { %v2937_v21 = vld [vmem:[%s3198_s18 + $0x18] sm:$0xff]  }
 0x6d0   : > { %v2822_v22 = vpop.f32.mrf.mxu0 }
 0x6d1   : > { %v2938_v22 = vld [vmem:[%s3198_s18 + $0x10] sm:$0xff]  }
 0x716   : > { %v2919_v25 = vpop.permute.xlu0 %2918 }
 0x717   : > { %v2921_v27 = vunpack.i.h.bf16 %v2919_v25  ;;  %v2920_v28 = vunpack.i.l.bf16 %v2919_v25  ;;  %v2939_v25 = vld [vmem:[%s3198_s18 + $0x8] sm:$0xff]  }
 0x719   : > { %v1496_v32 = vsel %vm1037_vm6, %v1145_v52, %v2921_v27  ;;  %v1964_v35 = vsel %vm1037_vm6, %v1613_v3, %v2920_v28  ;;  %v2643_v27 = vld [vmem:[%s739_s9] ss:$0 sm:$0xff] }
 0x733   : > { %v2924_v26 = vpop.permute.xlu1 %2923 }
 0x734   : > { %v2926_v30 = vunpack.i.h.bf16 %v2924_v26  ;;  %v2925_v31 = vunpack.i.l.bf16 %v2924_v26  ;;  %v2940_v26 = vld [vmem:[%s3198_s18] sm:$0xff]  }
 0x736   : > { %v1498_v33 = vsel %vm1497_vm11, %v1496_v32, %v2926_v30  ;;  %v1965_v36 = vsel %vm1497_vm11, %v1964_v35, %v2925_v31 }
 0x737   : > { %v1494_v34 = vpop.permute.xlu1 %1493 }
 0x738   : > { %v1500_v41 = vsel %vm1499_vm12, %v1498_v33, %v1494_v34 }
 0x73d   : > { %v1962_v37 = vpop.permute.xlu0 %1961 }
 0x73e   : > { %v1966_v39 = vsel %vm1499_vm12, %v1965_v36, %v1962_v37 }
 0x73f   : > { %v1968_v40 = vrot.slane %v1966_v39, 3 }
 0x741   : > { %v1971_v42 = vsel %vm1970_vm13, %v1500_v41, %v1968_v40 }
 0x742   : > { %v1976_v43 = vpack.c.bf16 %v1968_v40, %v1971_v42 }
 0x744   : > { %2828 = vmatmul.mubr.msk.bf16.vlgmr.msra.gmra.mxu1 %vm920_vm3, %v1976_v43 }
 0x745   : > { %2855 = vmatprep.mubr.msk.bf16.mxu1 %vm3019_vm5, %v3018_v38  ;;  %2840 = vmatpush3.bf16.msra.mxu1 %v2933_v17 }
 0x746   : > { %2841 = vmatprep.subr.bf16.mxu1 %v3018_v38 }
 0x749   : > { %2842 = vmatpush3.bf16.msra.mxu1 %v2934_v18 }
 0x74a   : > { %2843 = vmatprep.subr.bf16.mxu1 %v3018_v38 }
 0x74d   : > { %2844 = vmatpush3.bf16.msra.mxu1 %v2935_v19 }
 0x74e   : > { %2845 = vmatprep.subr.bf16.mxu1 %v3018_v38 }
 0x751   : > { %2846 = vmatpush3.bf16.msra.mxu1 %v2936_v20 }
 0x752   : > { %2847 = vmatprep.subr.bf16.mxu1 %v3018_v38 }
 0x755   : > { %2848 = vmatpush3.bf16.msra.mxu1 %v2937_v21 }
 0x756   : > { %2849 = vmatprep.subr.bf16.mxu1 %v3018_v38 }
 0x759   : > { %2850 = vmatpush3.bf16.msra.mxu1 %v2938_v22 }
 0x75a   : > { %2851 = vmatprep.subr.bf16.mxu1 %v3018_v38 }
 0x75d   : > { %2852 = vmatpush3.bf16.msra.mxu1 %v2939_v25 }
 0x75e   : > { %2853 = vmatprep.subr.bf16.mxu1 %v3018_v38 }
 0x761   : > { %2854 = vmatpush3.bf16.msra.mxu1 %v2940_v26 }
 0x804   : > { %v2026_v44 = vpop.f32.mrf.mxu1 }
 0x805   : > { %v2033_v46 = vadd.f32 %v2026_v44, %v3255_v23 }
 0x806   : > { %v2829_v47 = vpop.f32.mrf.mxu1 }
 0x807   : > { %v3489_v48 = vadd.f32 %v2640_v45, %v2033_v46 }
 0x808   : > { %v2029_v49 = vpop.f32.mrf.mxu1 }
 0x809   : > { %v2034_v50 = vadd.f32 %v2029_v49, %v3257_v24  ;;  %v2046_v51 = vsel %vm920_vm3, %v3489_v48, 0.0 }
 0x80a   : > { %2047 = vadd.xlane.f32.xlu0 %v2046_v51  ;;  %v2830_v52 = vpop.f32.mrf.mxu1 }
 0x80b   : > { %v3494_v29 = vadd.f32 %v2640_v45, %v2034_v50 }
 0x80d   : > { %v2049_v53 = vsel %vm924_vm4, %v3494_v29, 0.0 }
 0x80e   : > { %2050 = vadd.xlane.f32.xlu1 %v2049_v53 }
 0x893   : > { %v2048_v23 = vpop.xlane.xlu0 %2047 }
 0x894   : > { %v2052_v54 = vmul.f32 0.03125, %v2048_v23 }
 0x896   : > { %v2054_v55 = vsub.f32 %v3489_v48, %v2052_v54 }
 0x897   : > { %v2051_v56 = vpop.xlane.xlu1 %2050 }
 0x898   : > { %v2053_v57 = vmul.f32 0.03125, %v2051_v56  ;;  %v2056_v24 = vmul.f32 %v2054_v55, %v2054_v55 }
 0x89a   : > { %v2055_v58 = vsub.f32 %v3494_v29, %v2053_v57  ;;  %v2058_v59 = vsel %vm920_vm3, %v2056_v24, 0.0 }
 0x89b   : > { %2059 = vadd.xlane.f32.xlu0 %v2058_v59 }
 0x89c   : > { %v2057_v60 = vmul.f32 %v2055_v58, %v2055_v58 }
 0x89e   : > { %v2061_v62 = vsel %vm924_vm4, %v2057_v60, 0.0 }
 0x89f   : > { %2062 = vadd.xlane.f32.xlu0 %v2061_v62 }
 0x924   : > { %v2060_v1 = vpop.xlane.xlu0 %2059 }
 0x925   : > { %v2064_v61 = vmul.f32 0.03125, %v2060_v1 }
 0x927   : > { %v2066_v2 = vadd.f32 1e-06, %v2064_v61 }
 0x928   : > { %v2063_v3 = vpop.xlane.xlu0 %2062 }
 0x929   : > { %2977 = vrsqrt.f32 %v2066_v2  ;;  %v2065_v4 = vmul.f32 0.03125, %v2063_v3 }
 0x92b   : > { %v2067_v5 = vadd.f32 1e-06, %v2065_v4 }
 0x92d   : > { %2979 = vrsqrt.f32 %v2067_v5 }
 0x936   : > { %v2978_v7 = vpop.eup %2977 }
 0x937   : > { %v2070_v8 = vmul.f32 %v2978_v7, %v2054_v55  ;;  %v2655_v55 = vld [vmem:[%s747_s21] ss:$0 sm:$0xff] }
 0x939   : > { %v2078_v6 = vmul.f32 %v2641_v9, %v2070_v8 }
 0x93a   : > { %v2980_v10 = vpop.eup %2979 }
 0x93b   : > { %v2071_v11 = vmul.f32 %v2980_v10, %v2055_v58  ;;  %v2086_v14 = vadd.f32 %v2642_v12, %v2078_v6 }
 0x93d   : > { %v2079_v13 = vmul.f32 %v2641_v9, %v2071_v11 }
 0x93f   : > { %v2087_v15 = vadd.f32 %v2642_v12, %v2079_v13 }
 0x941   : > { %v2092_v16 = vpack.c.bf16 %v2087_v15, %v2086_v14 }
 0x943   : > { %2836 = vmatmul.mubr.msk.bf16.vlgmr.msra.gmra.mxu0 %vm920_vm3, %v2092_v16 }
 0xa03   : > { %v2149_v28 = vpop.f32.mrf.mxu0 }
 0xa04   : > { %v2150_v30 = vadd.f32 %v2643_v27, %v2149_v28 }
 0xa05   : > { %v2837_v31 = vpop.f32.mrf.mxu0 }
 0xa06   : > { %v2156_v32 = vmul.f32 %v2150_v30, %v2150_v30 }
 0xa07   : > { %v2152_v35 = vpop.f32.mrf.mxu0 }
 0xa08   : > { %v2158_v34 = vmul.f32 %v2156_v32, %v2150_v30  ;;  %v2153_v33 = vadd.f32 %v2643_v27, %v2152_v35 }
 0xa09   : > { %v2838_v36 = vpop.f32.mrf.mxu0 }
 0xa0a   : > { %v2160_v37 = vmul.f32 0.044715, %v2158_v34  ;;  %v2157_v39 = vmul.f32 %v2153_v33, %v2153_v33 }
 0xa0c   : > { %v2162_v40 = vadd.f32 %v2160_v37, %v2150_v30  ;;  %v2159_v41 = vmul.f32 %v2157_v39, %v2153_v33 }
 0xa0e   : > { %v2164_v38 = vmul.f32 0.7978846, %v2162_v40  ;;  %v2161_v42 = vmul.f32 0.044715, %v2159_v41 }
 0xa10   : > { %2981 = vtanh.f32 %v2164_v38  ;;  %v2163_v43 = vadd.f32 %v2161_v42, %v2153_v33 }
 0xa12   : > { %v2165_v44 = vmul.f32 0.7978846, %v2163_v43 }
 0xa14   : > { %2983 = vtanh.f32 %v2165_v44 }
 0xa1d   : > { %v2982_v45 = vpop.eup %2981 }
 0xa1e   : > { %v2168_v46 = vadd.f32 1.0, %v2982_v45 }
 0xa20   : > { %v2170_v49 = vmul.f32 0.5, %v2168_v46 }
 0xa21   : > { %v2984_v47 = vpop.eup %2983 }
 0xa22   : > { %v2169_v50 = vadd.f32 1.0, %v2984_v47  ;;  %v2172_v52 = vmul.f32 %v2170_v49, %v2150_v30 }
 0xa24   : > { %v2171_v51 = vmul.f32 0.5, %v2169_v50 }
 0xa26   : > { %v2173_v53 = vmul.f32 %v2171_v51, %v2153_v33 }
 0xa28   : > { %v2190_v23 = vpack.c.bf16 %v2173_v53, %v2172_v52 }
 0xa2a   : > { %2856 = vmatmul.mubr.bf16.vlgmr.msra.gmra.mxu1 %v2190_v23 }
 0xaea   : > { %v2273_v54 = vpop.f32.mrf.mxu1 }
 0xaeb   : > { %v2280_v56 = vadd.f32 %v2273_v54, %v3489_v48 }
 0xaec   : > { %v2857_v57 = vpop.f32.mrf.mxu1 }
 0xaed   : > { %v2289_v24 = vadd.f32 %v2655_v55, %v2280_v56 }
 0xaee   : > { %v2276_v58 = vpop.f32.mrf.mxu1 }
 0xaef   : > { %2291 = vst.msk [vmem:[#allocation2] sm:$0xff] %vm920_vm3, %v2289_v24  ;;  %v2281_v59 = vadd.f32 %v2276_v58, %v3494_v29  ;;  %2295 = sbr.rel (%p2599_p5) target bundleno = 3117 (0xc2d), region = 96 }
 0xaf0   : > { %v2858_v60 = vpop.f32.mrf.mxu1 }
 0xaf1   : > { %v2290_v62 = vadd.f32 %v2655_v55, %v2281_v59 }
 0xaf3   : > { %2292 = vst.msk [vmem:[#allocation2 + $0x8] sm:$0x3] %vm924_vm4, %v2290_v62 }
 0xaf4   : > { %v2298_v63 = vsel %vm920_vm3, %v2289_v24, 0.0  ;;  %v2301_v0 = vsel %vm924_vm4, %v2290_v62, 0.0  ;;  %v2657_v15 = vld [vmem:[%s3636_s27] ss:$0 sm:$0xff] }
 0xaf5   : > { %2299 = vadd.xlane.f32.xlu0 %v2298_v63  ;;  %v2658_v17 = vld [vmem:[%s3637_s30] ss:$0 sm:$0xff] }
 0xaf9   : > { %2302 = vadd.xlane.f32.xlu0 %v2301_v0 }
 0xb7e   : > { %v2300_v48 = vpop.xlane.xlu0 %2299 }
 0xb7f   : > { %v2304_v1 = vmul.f32 0.03125, %v2300_v48 }
 0xb81   : > { %v2306_v61 = vsub.f32 %v2289_v24, %v2304_v1 }
 0xb82   : > { %v2303_v2 = vpop.xlane.xlu0 %2302 }
 0xb83   : > { %v2305_v3 = vmul.f32 0.03125, %v2303_v2  ;;  %v2308_v4 = vmul.f32 %v2306_v61, %v2306_v61 }
 0xb85   : > { %v2307_v29 = vsub.f32 %v2290_v62, %v2305_v3  ;;  %v2310_v5 = vsel %vm920_vm3, %v2308_v4, 0.0 }
 0xb86   : > { %2311 = vadd.xlane.f32.xlu1 %v2310_v5 }
 0xb87   : > { %v2309_v7 = vmul.f32 %v2307_v29, %v2307_v29 }
 0xb89   : > { %v2313_v8 = vsel %vm924_vm4, %v2309_v7, 0.0 }
 0xb8a   : > { %2314 = vadd.xlane.f32.xlu1 %v2313_v8 }
 0xc0f   : > { %v2312_v9 = vpop.xlane.xlu1 %2311 }
 0xc10   : > { %v2316_v10 = vmul.f32 0.03125, %v2312_v9 }
 0xc12   : > { %v2318_v11 = vadd.f32 1e-06, %v2316_v10 }
 0xc13   : > { %v2315_v6 = vpop.xlane.xlu1 %2314 }
 0xc14   : > { %2985 = vrsqrt.f32 %v2318_v11  ;;  %v2317_v12 = vmul.f32 0.03125, %v2315_v6 }
 0xc16   : > { %v2319_v13 = vadd.f32 1e-06, %v2317_v12 }
 0xc18   : > { %2987 = vrsqrt.f32 %v2319_v13 }
 0xc21   : > { %v2986_v14 = vpop.eup %2985 }
 0xc22   : > { %v2322_v16 = vmul.f32 %v2986_v14, %v2306_v61 }
 0xc24   : > { %v2330_v18 = vmul.f32 %v2657_v15, %v2322_v16 }
 0xc25   : > { %v2988_v19 = vpop.eup %2987 }
 0xc26   : > { %v2338_v20 = vadd.f32 %v2658_v17, %v2330_v18  ;;  %v2323_v21 = vmul.f32 %v2988_v19, %v2307_v29 }
 0xc28   : > { %2340 = vst.msk [vmem:[%s3638_s22] sm:$0xff] %vm920_vm3, %v2338_v20  ;;  %v2331_v22 = vmul.f32 %v2657_v15, %v2323_v21 }
 0xc2a   : > { %v2339_v25 = vadd.f32 %v2658_v17, %v2331_v22 }
 0xc2c   : > { %2341 = vst.msk [vmem:[%s3638_s22 + $0x8] sm:$0x3] %vm924_vm4, %v2339_v25 }
 0xc2d PF: > { %p2659_p6 = scmp.ne.s32.totalorder %s3007_s24, 1 }
 0xc2e   : > { %s3639_s17 = sld [smem:[#allocation9_spill]] (!%p2659_p6)  ;;  %s3035_s18 = smov (!%p2659_p6), 32  }
 0xc2f   : > { %2345 = sbr.rel (%p2659_p6) target bundleno = 3552 (0xde0), region = 100  ;;  %s3640_s9 = sld [smem:[#allocation10_spill]] (!%p2659_p6) }
 0xc30   : > { %s3641_s27 = sld [smem:[#allocation13_spill]] (!%p2659_p6) }
 0xc34   : > { %v2348_v26 = vsel %vm920_vm3, %v2289_v24, 0.0  ;;  %v2351_v27 = vsel %vm924_vm4, %v2290_v62, 0.0  ;;  %v2660_v46 = vld [vmem:[%s3639_s17] ss:$0 sm:$0xff]  ;;  %vm2398_vm14 = vcmask 523520   ;;  %vm2400_vm15 = vcmask 517376  }
 0xc35   : > { %2349 = vadd.xlane.f32.xlu0 %v2348_v26  ;;  %v2661_v49 = vld [vmem:[%s3640_s9] ss:$0 sm:$0xff] }
 0xc39   : > { %2352 = vadd.xlane.f32.xlu0 %v2351_v27 }
 0xcbe   : > { %v2350_v28 = vpop.xlane.xlu0 %2349 }
 0xcbf   : > { %v2354_v30 = vmul.f32 0.03125, %v2350_v28 }
 0xcc1   : > { %v2356_v31 = vsub.f32 %v2289_v24, %v2354_v30 }
 0xcc2   : > { %v2353_v32 = vpop.xlane.xlu0 %2352 }
 0xcc3   : > { %v2355_v35 = vmul.f32 0.03125, %v2353_v32  ;;  %v2358_v34 = vmul.f32 %v2356_v31, %v2356_v31 }
 0xcc5   : > { %v2357_v33 = vsub.f32 %v2290_v62, %v2355_v35  ;;  %v2360_v36 = vsel %vm920_vm3, %v2358_v34, 0.0 }
 0xcc6   : > { %2361 = vadd.xlane.f32.xlu1 %v2360_v36 }
 0xcc7   : > { %v2359_v37 = vmul.f32 %v2357_v33, %v2357_v33 }
 0xcc9   : > { %v2363_v39 = vsel %vm924_vm4, %v2359_v37, 0.0 }
 0xcca   : > { %2364 = vadd.xlane.f32.xlu1 %v2363_v39 }
 0xd4f   : > { %v2362_v40 = vpop.xlane.xlu1 %2361 }
 0xd50   : > { %v2366_v41 = vmul.f32 0.03125, %v2362_v40 }
 0xd52   : > { %v2368_v38 = vadd.f32 1e-06, %v2366_v41 }
 0xd53   : > { %v2365_v42 = vpop.xlane.xlu1 %2364 }
 0xd54   : > { %2989 = vrsqrt.f32 %v2368_v38  ;;  %v2367_v43 = vmul.f32 0.03125, %v2365_v42 }
 0xd56   : > { %v2369_v44 = vadd.f32 1e-06, %v2367_v43 }
 0xd58   : > { %2991 = vrsqrt.f32 %v2369_v44 }
 0xd61   : > { %v2990_v45 = vpop.eup %2989 }
 0xd62   : > { %v2372_v47 = vmul.f32 %v2990_v45, %v2356_v31 }
 0xd64   : > { %v2380_v50 = vmul.f32 %v2660_v46, %v2372_v47 }
 0xd65   : > { %v2992_v51 = vpop.eup %2991 }
 0xd66   : > { %v2388_v52 = vadd.f32 %v2661_v49, %v2380_v50  ;;  %v2373_v53 = vmul.f32 %v2992_v51, %v2357_v33 }
 0xd68   : > { %2392 = vrot.lane.b32.xlu0 %v2388_v52, %s3035_s18  ;;  %v2381_v23 = vmul.f32 %v2660_v46, %v2373_v53 }
 0xd6a   : > { %v2389_v54 = vadd.f32 %v2661_v49, %v2381_v23 }
 0xd6c   : > { %2394 = vrot.lane.b32.xlu1 %v2389_v54, %s3035_s18 }
 0xdda   : > { %v2393_v55 = vpop.permute.xlu0 %2392 }
 0xddb   : > { %2399 = vst.msk [vmem:[%s3641_s27] sm:$0xff] %vm2398_vm14, %v2393_v55 }
 0xdde   : > { %v2395_v56 = vpop.permute.xlu1 %2394 }
 0xddf   : > { %2401 = vst.msk [vmem:[%s3641_s27 + $0x8] sm:$0x3] %vm2400_vm15, %v2395_v56 }
 0xde0 PF: > { %s3642_s30 = sld [smem:[#allocation4_spill]] }
 0xde1   : > { %s3643_s24 = sld [smem:[#allocation3_spill]] }
 0xde2   : > { %s3644_s25 = sld [smem:[#allocation5_spill]] }
 0xde6   : > { %s27_s26 = sadd.s32 1, %s3642_s30  }
 0xde7   : > { %p24_p7 = scmp.ge.s32.totalorder %s27_s26, 4  }
 0xde9   :  { %26 = sbr.rel (!%p24_p7) target bundleno = 8 (0x8), region = 166 }

</bundles_post_ra>
